<compile_context>
chip_gen: v6e
topology: v6e:2x2x1
jax: 0.10.0
libtpu: 0.0.40
codegen_flags: <defaults>
</compile_context>

<pallas_src>
import functools
import math

import jax
import jax.numpy as jnp
from jax.experimental import pallas as pl
from jax.experimental.pallas import tpu as pltpu


# ------------------------- per-generation configuration -------------------------

def _tpu_vmem_capacity():
    try:
        cap = getattr(pltpu.get_tpu_info(), "vmem_capacity_bytes", None)
        if cap:
            return int(cap)
    except Exception:
        pass
    try:
        kind = jax.devices()[0].device_kind.lower()
        if "v5" in kind or "v6" in kind:
            return 128 * 1024 * 1024
    except Exception:
        pass
    return 64 * 1024 * 1024  # conservative (v7x-safe) default


_VMEM_CAP = _tpu_vmem_capacity()
_VMEM_LIMIT = int(min((3 * _VMEM_CAP) // 4, 100 * 1024 * 1024))   # 48 MiB on v7x, 96 MiB on v5e/v6e
_TM_TARGET = 256 if _VMEM_CAP <= 64 * 1024 * 1024 else 512        # row-tile target per generation


def _cparams(semantics):
    return pltpu.CompilerParams(dimension_semantics=tuple(semantics),
                                vmem_limit_bytes=_VMEM_LIMIT)


# ------------------------------ shared math helpers ------------------------------

def _layer_norm(x, gamma, beta, eps=1e-5):
    mean = jnp.mean(x, axis=-1, keepdims=True)
    var = jnp.mean((x - mean) ** 2, axis=-1, keepdims=True)
    return (x - mean) * jax.lax.rsqrt(var + eps) * gamma + beta


def _erf_approx(x):
    # Abramowitz & Stegun 7.1.26 (|abs err| ~1.5e-7).  Uses only exp/mul/add,
    # which lower cleanly in Mosaic (exp takes the otherwise-idle EUP slot).
    a1, a2, a3, a4, a5 = (0.254829592, -0.284496736, 1.421413741,
                          -1.453152027, 1.061405429)
    p = 0.3275911
    ax = jnp.abs(x)
    t = 1.0 / (1.0 + p * ax)
    poly = ((((a5 * t + a4) * t + a3) * t + a2) * t + a1) * t
    y = 1.0 - poly * jnp.exp(-ax * ax)
    return jnp.where(x < 0, -y, y)


def _gelu(x):
    # PyTorch default 'gelu' (exact, erf-based).
    return 0.5 * x * (1.0 + _erf_approx(x * (1.0 / math.sqrt(2.0))))


# --------------------------------- tiling helpers ---------------------------------

def _row_tiling(n, tm_target=None):
    """Pick a row tile (multiple of 8) and the padded row count it divides."""
    if tm_target is None:
        tm_target = _TM_TARGET
    n8 = ((n + 7) // 8) * 8
    if n8 <= tm_target:
        return n8, n8
    for tm in range(tm_target, max(tm_target // 4, 8) - 1, -8):
        if n8 % tm == 0:
            return tm, n8
    tm = tm_target
    return tm, ((n8 + tm - 1) // tm) * tm


def _pad_rows(a, n_pad):
    n = a.shape[0]
    if n_pad == n:
        return a
    return jnp.pad(a, ((0, n_pad - n), (0, 0)))


def _ffn_tile(f):
    # Bound the (TM, FT) GELU intermediate and the resident W1/W2 slices.
    if f <= 1024:
        return f
    for ft in (1024, 512, 256, 128):
        if f % ft == 0:
            return ft
    return f


def _q_tile(s):
    # TODO(synk): replace the (TQ, S) score block with a flash-style KV-streamed
    # online softmax for very long sequences (avoids re-projecting K/V per q tile).
    if s <= 1024:
        return s
    for tq in (512, 256, 128):
        if s % tq == 0:
            return tq
    return s


# ---------------------------------- Pallas kernels ----------------------------------

def embed_ln_kernel(tok_ref, pos_ref, g_ref, b_ref, o_ref):
    # (token_embeddings + positional_embeddings) -> LayerNorm (post-embedding LN,
    # since normalize_before=False in the reference module).
    o_ref[...] = _layer_norm(tok_ref[...] + pos_ref[...], g_ref[...], b_ref[...])


def attention_kernel(*refs, scale, separate_q):
    # Fused per-head QKV projection + attention + output projection.
    # grid = (batch, q_tile, head); head is a reduction axis accumulated into
    # a (TQ, D) f32 scratch so the output block is lane-dense (TQ, D).
    o_ref, acc_ref = refs[-2], refs[-1]
    if separate_q:
        (xq_ref, xkv_ref, wq_ref, wk_ref, wv_ref, bq_ref, bk_ref, bv_ref,
         wo_ref, bo_ref, bias_ref) = refs[:-2]
    else:
        (xkv_ref, wq_ref, wk_ref, wv_ref, bq_ref, bk_ref, bv_ref,
         wo_ref, bo_ref, bias_ref) = refs[:-2]

    h = pl.program_id(2)

    @pl.when(h == 0)
    def _():
        acc_ref[...] = jnp.zeros_like(acc_ref)

    xkv = xkv_ref[0].astype(jnp.bfloat16)                    # (S, D)
    xq = xq_ref[0].astype(jnp.bfloat16) if separate_q else xkv   # (TQ, D)

    q = jnp.dot(xq, wq_ref[0], preferred_element_type=jnp.float32) + bq_ref[0]
    k = jnp.dot(xkv, wk_ref[0], preferred_element_type=jnp.float32) + bk_ref[0]
    v = jnp.dot(xkv, wv_ref[0], preferred_element_type=jnp.float32) + bv_ref[0]

    s = jax.lax.dot_general(q.astype(jnp.bfloat16), k.astype(jnp.bfloat16),
                            (((1,), (1,)), ((), ())),
                            preferred_element_type=jnp.float32) * scale   # (TQ, S)
    s = s + bias_ref[0]                                       # f32 key-padding bias
    s = s - jnp.max(s, axis=-1, keepdims=True)
    p = jnp.exp(s)
    p = p * pl.reciprocal(jnp.sum(p, axis=-1, keepdims=True), approx=True)

    ctx = jnp.dot(p.astype(jnp.bfloat16), v.astype(jnp.bfloat16),
                  preferred_element_type=jnp.float32)         # (TQ, hd)
    acc_ref[...] += jnp.dot(ctx.astype(jnp.bfloat16), wo_ref[0],
                            preferred_element_type=jnp.float32)  # (TQ, D)

    @pl.when(h == pl.num_programs(2) - 1)
    def _():
        o_ref[0] = (acc_ref[...] + bo_ref[...]).astype(o_ref.dtype)


def ffn_tail_kernel(attn_ref, res_ref, g1_ref, b1_ref, w1_ref, c1_ref,
                    w2_ref, c2_ref, g2_ref, b2_ref, o_ref, y_ref, acc_ref):
    # residual + LN1 + GELU FFN (F-tiled reduction) + residual + LN2.
    f = pl.program_id(1)

    @pl.when(f == 0)
    def _():
        y_ref[...] = _layer_norm(res_ref[...] + attn_ref[...],
                                 g1_ref[...], b1_ref[...])
        acc_ref[...] = jnp.zeros_like(acc_ref)

    hmid = jnp.dot(y_ref[...].astype(jnp.bfloat16), w1_ref[...],
                   preferred_element_type=jnp.float32) + c1_ref[...]
    hmid = _gelu(hmid)
    acc_ref[...] += jnp.dot(hmid.astype(jnp.bfloat16), w2_ref[...],
                            preferred_element_type=jnp.float32)

    @pl.when(f == pl.num_programs(1) - 1)
    def _():
        o_ref[...] = _layer_norm(y_ref[...] + acc_ref[...] + c2_ref[...],
                                 g2_ref[...], b2_ref[...])


# ------------------------------------- wrappers -------------------------------------

def embed_ln(tok_emb, pos_emb, gamma, beta):
    B, S, D = tok_emb.shape
    N = B * S
    TM, NP = _row_tiling(N)
    tok2 = _pad_rows(tok_emb.reshape(N, D), NP)
    pos2 = _pad_rows(pos_emb.reshape(N, D), NP)
    out = pl.pallas_call(
        embed_ln_kernel,
        out_shape=jax.ShapeDtypeStruct((NP, D), jnp.float32),
        grid=(NP // TM,),
        in_specs=[pl.BlockSpec((TM, D), lambda i: (i, 0)),
                  pl.BlockSpec((TM, D), lambda i: (i, 0)),
                  pl.BlockSpec((1, D), lambda i: (0, 0)),
                  pl.BlockSpec((1, D), lambda i: (0, 0))],
        out_specs=pl.BlockSpec((TM, D), lambda i: (i, 0)),
        compiler_params=_cparams(("parallel",)),
    )(tok2, pos2, gamma, beta)
    return out[:N].reshape(B, S, D)


def fused_attention(x, attn_bias, lp, num_heads):
    B, S, D = x.shape
    H = num_heads
    hd = D // H
    TQ = _q_tile(S)
    QT = S // TQ
    separate_q = QT > 1
    scale = 1.0 / math.sqrt(hd)

    kern = functools.partial(attention_kernel, scale=scale, separate_q=separate_q)

    x_specs, x_args = [], []
    if separate_q:
        x_specs.append(pl.BlockSpec((1, TQ, D), lambda b, q, h: (b, q, 0)))
        x_args.append(x)
    x_specs.append(pl.BlockSpec((1, S, D), lambda b, q, h: (b, 0, 0)))
    x_args.append(x)

    # TODO(synk): on v6e, process 2 heads per grid step to better fill the MXU.
    return pl.pallas_call(
        kern,
        out_shape=jax.ShapeDtypeStruct((B, S, D), jnp.float32),
        grid=(B, QT, H),
        in_specs=x_specs + [
            pl.BlockSpec((1, D, hd), lambda b, q, h: (h, 0, 0)),   # Wq (per head)
            pl.BlockSpec((1, D, hd), lambda b, q, h: (h, 0, 0)),   # Wk
            pl.BlockSpec((1, D, hd), lambda b, q, h: (h, 0, 0)),   # Wv
            pl.BlockSpec((1, 1, hd), lambda b, q, h: (h, 0, 0)),   # bq
            pl.BlockSpec((1, 1, hd), lambda b, q, h: (h, 0, 0)),   # bk
            pl.BlockSpec((1, 1, hd), lambda b, q, h: (h, 0, 0)),   # bv
            pl.BlockSpec((1, hd, D), lambda b, q, h: (h, 0, 0)),   # Wo (per head)
            pl.BlockSpec((1, D), lambda b, q, h: (0, 0)),          # bo
            pl.BlockSpec((1, 1, S), lambda b, q, h: (b, 0, 0)),    # key-padding bias
        ],
        out_specs=pl.BlockSpec((1, TQ, D), lambda b, q, h: (b, q, 0)),
        scratch_shapes=[pltpu.VMEM((TQ, D), jnp.float32)],
        compiler_params=_cparams(("parallel", "parallel", "arbitrary")),
    )(*x_args, lp['wq'], lp['wk'], lp['wv'], lp['bq'], lp['bk'], lp['bv'],
      lp['wo'], lp['bo'], attn_bias)


def ffn_tail(attn_out, x, lp):
    B, S, D = x.shape
    N = B * S
    F = lp['w1'].shape[1]
    TM, NP = _row_tiling(N)
    FT = _ffn_tile(F)
    a2 = _pad_rows(attn_out.reshape(N, D), NP)
    x2 = _pad_rows(x.reshape(N, D), NP)
    # TODO(synk): mark the constant-index weight BlockSpecs pipeline_mode=pl.Buffered(1)
    # once the F axis is a single tile, and emit an extra bf16 copy of the output so
    # the next layer's QKV read does not re-read the f32 activation.
    out = pl.pallas_call(
        ffn_tail_kernel,
        out_shape=jax.ShapeDtypeStruct((NP, D), jnp.float32),
        grid=(NP // TM, F // FT),
        in_specs=[
            pl.BlockSpec((TM, D), lambda i, f: (i, 0)),   # attention output
            pl.BlockSpec((TM, D), lambda i, f: (i, 0)),   # residual x
            pl.BlockSpec((1, D), lambda i, f: (0, 0)),    # ln1 gamma
            pl.BlockSpec((1, D), lambda i, f: (0, 0)),    # ln1 beta
            pl.BlockSpec((D, FT), lambda i, f: (0, f)),   # W1 column slice
            pl.BlockSpec((1, FT), lambda i, f: (0, f)),   # b1 slice
            pl.BlockSpec((FT, D), lambda i, f: (f, 0)),   # W2 row slice
            pl.BlockSpec((1, D), lambda i, f: (0, 0)),    # b2
            pl.BlockSpec((1, D), lambda i, f: (0, 0)),    # ln2 gamma
            pl.BlockSpec((1, D), lambda i, f: (0, 0)),    # ln2 beta
        ],
        out_specs=pl.BlockSpec((TM, D), lambda i, f: (i, 0)),
        scratch_shapes=[pltpu.VMEM((TM, D), jnp.float32),   # y = LN1(res + attn)
                        pltpu.VMEM((TM, D), jnp.float32)],  # FFN accumulator
        compiler_params=_cparams(("parallel", "arbitrary")),
    )(a2, x2, lp['g1'], lp['b1'], lp['w1'], lp['c1'],
      lp['w2'], lp['c2'], lp['g2'], lp['b2'])
    return out[:N].reshape(B, S, D)


def encoder_layer(x, attn_bias, lp, num_heads):
    attn_out = fused_attention(x, attn_bias, lp, num_heads)
    return ffn_tail(attn_out, x, lp)


def prepare_params(params, num_heads):
    """One-time (outside jit) weight layout prep: transpose, per-head split, bf16."""
    D = params['token_emb'].shape[1]
    H = num_heads
    hd = D // H

    def per_head(w):   # (D_out=D, D_in=D) torch-Linear weight -> (H, D_in, hd)
        return jnp.transpose(w.T.reshape(D, H, hd), (1, 0, 2)).astype(jnp.bfloat16)

    prepped = {
        'token_emb': params['token_emb'],
        'pos_emb': params['pos_emb'],
        'emb_ln_g': params['emb_ln_g'].reshape(1, D),
        'emb_ln_b': params['emb_ln_b'].reshape(1, D),
        'layers': [],
    }
    for p in params['layers']:
        wq, wk, wv = jnp.split(p['in_proj_w'], 3, axis=0)
        bq, bk, bv = jnp.split(p['in_proj_b'], 3)
        prepped['layers'].append({
            'wq': per_head(wq), 'wk': per_head(wk), 'wv': per_head(wv),
            'bq': bq.reshape(H, 1, hd), 'bk': bk.reshape(H, 1, hd),
            'bv': bv.reshape(H, 1, hd),
            'wo': p['out_proj_w'].T.reshape(H, hd, D).astype(jnp.bfloat16),
            'bo': p['out_proj_b'].reshape(1, D),
            'g1': p['ln1_g'].reshape(1, D), 'b1': p['ln1_b'].reshape(1, D),
            'w1': p['lin1_w'].T.astype(jnp.bfloat16),
            'c1': p['lin1_b'].reshape(1, -1),
            'w2': p['lin2_w'].T.astype(jnp.bfloat16),
            'c2': p['lin2_b'].reshape(1, D),
            'g2': p['ln2_g'].reshape(1, D), 'b2': p['ln2_b'].reshape(1, D),
        })
    return prepped


def transformer_encoder_forward(tokens, prepped, *, num_heads, padding_idx):
    # Embedding gathers / position cumsum are cheap XLA glue.
    # TODO(synk): fuse the gathers into embed_ln via PrefetchScalarGridSpec row-gather.
    pad_mask = tokens == padding_idx
    tok_emb = prepped['token_emb'][tokens]
    nonpad = (~pad_mask).astype(jnp.int32)
    positions = jnp.cumsum(nonpad, axis=1) * nonpad + padding_idx
    pos_emb = prepped['pos_emb'][positions]

    x = embed_ln(tok_emb, pos_emb, prepped['emb_ln_g'], prepped['emb_ln_b'])
    # nn.Dropout is identity in eval/inference mode.

    attn_bias = jnp.where(pad_mask, jnp.float32(-1e30),
                          jnp.float32(0.0))[:, None, :]       # (B, 1, S)

    # TODO(synk): prefetch layer i+1's weights under layer i's compute
    # (cross-call DMA future) to hide per-layer weight DMA.
    for lp in prepped['layers']:
        x = encoder_layer(x, attn_bias, lp, num_heads)

    # TODO(synk): fold this transpose into the last layer's out_spec index_map.
    return jnp.transpose(x, (1, 0, 2))                        # (S, B, D)


# ---------------------------------- pure-JAX reference ----------------------------------

def _gelu_ref(x):
    return jax.nn.gelu(x, approximate=False)


def _ref_layer(x, attn_bias, p, num_heads):
    B, S, D = x.shape
    hd = D // num_heads
    scale = 1.0 / math.sqrt(hd)
    qkv = jnp.einsum('bsd,ed->bse', x, p['in_proj_w'],
                     precision=jax.lax.Precision.HIGHEST) + p['in_proj_b']
    q, k, v = qkv[..., :D], qkv[..., D:2 * D], qkv[..., 2 * D:]
    q = q.reshape(B, S, num_heads, hd)
    k = k.reshape(B, S, num_heads, hd)
    v = v.reshape(B, S, num_heads, hd)
    s = jnp.einsum('bqhd,bkhd->bhqk', q, k,
                   precision=jax.lax.Precision.HIGHEST) * scale + attn_bias[:, None]
    p_attn = jax.nn.softmax(s, axis=-1)
    ctx = jnp.einsum('bhqk,bkhd->bqhd', p_attn, v,
                     precision=jax.lax.Precision.HIGHEST).reshape(B, S, D)
    attn = jnp.einsum('bsd,ed->bse', ctx, p['out_proj_w'],
                      precision=jax.lax.Precision.HIGHEST) + p['out_proj_b']
    x = _layer_norm(x + attn, p['ln1_g'], p['ln1_b'])
    h1 = _gelu_ref(jnp.einsum('bsd,fd->bsf', x, p['lin1_w'],
                              precision=jax.lax.Precision.HIGHEST) + p['lin1_b'])
    h2 = jnp.einsum('bsf,df->bsd', h1, p['lin2_w'],
                    precision=jax.lax.Precision.HIGHEST) + p['lin2_b']
    return _layer_norm(x + h2, p['ln2_g'], p['ln2_b'])


def reference_forward(tokens, params, *, num_heads, padding_idx):
    pad_mask = tokens == padding_idx
    tok_emb = params['token_emb'][tokens]
    nonpad = (~pad_mask).astype(jnp.int32)
    positions = jnp.cumsum(nonpad, axis=1) * nonpad + padding_idx
    pos_emb = params['pos_emb'][positions]
    x = _layer_norm(tok_emb + pos_emb, params['emb_ln_g'], params['emb_ln_b'])
    attn_bias = jnp.where(pad_mask, jnp.float32(-1e30), jnp.float32(0.0))[:, None, :]
    for lp in params['layers']:
        x = _ref_layer(x, attn_bias, lp, num_heads)
    return jnp.transpose(x, (1, 0, 2))


# ------------------------------------- param init -------------------------------------

def init_params(key, *, vocab_size, max_seq_len, embedding_dim, ffn_dim,
                num_layers, padding_idx):
    D, F = embedding_dim, ffn_dim
    keys = jax.random.split(key, 4 + num_layers)

    def normal(k, shape, s=0.02):
        return jax.random.normal(k, shape, jnp.float32) * s

    token_emb = normal(keys[0], (vocab_size, D)).at[padding_idx].set(0.0)
    pos_emb = normal(keys[1], (max_seq_len, D)).at[padding_idx].set(0.0)
    emb_ln_g = 1.0 + normal(keys[2], (D,), 0.01)
    emb_ln_b = normal(keys[3], (D,), 0.01)

    layers = []
    for li in range(num_layers):
        lk = jax.random.split(keys[4 + li], 12)
        layers.append({
            'in_proj_w': normal(lk[0], (3 * D, D)),
            'in_proj_b': normal(lk[1], (3 * D,)),
            'out_proj_w': normal(lk[2], (D, D)),
            'out_proj_b': normal(lk[3], (D,)),
            'ln1_g': 1.0 + normal(lk[4], (D,), 0.01),
            'ln1_b': normal(lk[5], (D,), 0.01),
            'lin1_w': normal(lk[6], (F, D)),
            'lin1_b': normal(lk[7], (F,)),
            'lin2_w': normal(lk[8], (D, F)),
            'lin2_b': normal(lk[9], (D,)),
            'ln2_g': 1.0 + normal(lk[10], (D,), 0.01),
            'ln2_b': normal(lk[11], (D,), 0.01),
        })

    return {'token_emb': token_emb, 'pos_emb': pos_emb,
            'emb_ln_g': emb_ln_g, 'emb_ln_b': emb_ln_b, 'layers': layers}


# ----------------------------------------- main -----------------------------------------

if __name__ == "__main__":
    configs = [
        # tiny, module-consistent config
        dict(vocab=50, D=32, F=64, H=4, L=2, max_seq=64, pad=1, B=2, S=8, tol=3e-2),
        # representative config: exercises (8,128) lane tiling, multi-row-tile grid
        # with tail padding, hd=64 heads, multi-layer-free (1 layer) but real sizes
        dict(vocab=100, D=256, F=1024, H=4, L=1, max_seq=512, pad=1, B=2, S=332, tol=5e-2),
    ]

    for ci, cfg in enumerate(configs):
        key = jax.random.PRNGKey(0)
        pkey, tkey = jax.random.split(key)
        params = init_params(pkey, vocab_size=cfg['vocab'], max_seq_len=cfg['max_seq'],
                             embedding_dim=cfg['D'], ffn_dim=cfg['F'],
                             num_layers=cfg['L'], padding_idx=cfg['pad'])

        tokens = jax.random.randint(tkey, (cfg['B'], cfg['S']), 2, cfg['vocab'],
                                    dtype=jnp.int32)
        tokens = tokens.at[1, -3:].set(cfg['pad'])            # padded tail positions

        prepped = prepare_params(params, cfg['H'])            # hoisted out of jit (one-time)
        fwd = jax.jit(functools.partial(transformer_encoder_forward,
                                        num_heads=cfg['H'], padding_idx=cfg['pad']))
        out = jax.block_until_ready(fwd(tokens, prepped))

        ref = jax.block_until_ready(
            reference_forward(tokens, params, num_heads=cfg['H'],
                              padding_idx=cfg['pad']))

        assert out.shape == (cfg['S'], cfg['B'], cfg['D']), \
            f"config {ci}: bad output shape {out.shape}"
        assert bool(jnp.all(jnp.isfinite(out))), f"config {ci}: non-finite output"
        err = float(jnp.max(jnp.abs(out - ref)))
        assert err < cfg['tol'], f"config {ci}: max abs err {err} vs reference"

    print("KERNEL_OK")
</pallas_src>

<mosaic_0001>
module attributes {stable_mosaic.version = 11 : i64} {
  func.func @attention_kernel(%arg0: i32, %arg1: i32, %arg2: i32, %arg3: memref<1x8x32xf32, #tpu.memory_space<vmem>>, %arg4: memref<1x32x8xbf16, #tpu.memory_space<vmem>>, %arg5: memref<1x32x8xbf16, #tpu.memory_space<vmem>>, %arg6: memref<1x32x8xbf16, #tpu.memory_space<vmem>>, %arg7: memref<1x1x8xf32, #tpu.memory_space<vmem>>, %arg8: memref<1x1x8xf32, #tpu.memory_space<vmem>>, %arg9: memref<1x1x8xf32, #tpu.memory_space<vmem>>, %arg10: memref<1x8x32xbf16, #tpu.memory_space<vmem>>, %arg11: memref<1x32xf32, #tpu.memory_space<vmem>>, %arg12: memref<1x1x8xf32, #tpu.memory_space<vmem>>, %arg13: memref<1x8x32xf32, #tpu.memory_space<vmem>>, %arg14: memref<8x32xf32, #tpu.memory_space<vmem>>) attributes {dimension_semantics = [#tpu.dimension_semantics<parallel>, #tpu.dimension_semantics<parallel>, #tpu.dimension_semantics<arbitrary>], iteration_bounds = array<i64: 2, 1, 4>, scalar_prefetch = 0 : i64, scratch_operands = 1 : i64, tpu.core_type = #tpu.core_type<tc>, window_params = [{transform_indices = @transform_0, window_bounds = array<i64: 1, 8, 32>}, {transform_indices = @transform_1, window_bounds = array<i64: 1, 32, 8>}, {transform_indices = @transform_2, window_bounds = array<i64: 1, 32, 8>}, {transform_indices = @transform_3, window_bounds = array<i64: 1, 32, 8>}, {transform_indices = @transform_4, window_bounds = array<i64: 1, 1, 8>}, {transform_indices = @transform_5, window_bounds = array<i64: 1, 1, 8>}, {transform_indices = @transform_6, window_bounds = array<i64: 1, 1, 8>}, {transform_indices = @transform_7, window_bounds = array<i64: 1, 8, 32>}, {pipeline_mode = #tpu.pipeline_mode<synchronous>, transform_indices = @transform_8, window_bounds = array<i64: 1, 32>}, {transform_indices = @transform_9, window_bounds = array<i64: 1, 1, 8>}, {transform_indices = @transform_10, window_bounds = array<i64: 1, 8, 32>}]} {
    %c0_i32 = arith.constant 0 : i32
    %0 = arith.cmpi eq, %arg2, %c0_i32 : i32
    %1 = arith.extui %0 : i1 to i32
    %c0_i32_0 = arith.constant 0 : i32
    %2 = arith.cmpi ne, %1, %c0_i32_0 : i32
    scf.if %2 {
      %cst_40 = arith.constant 0.000000e+00 : f32
      %59 = vector.broadcast %cst_40 : f32 to vector<8x32xf32>
      %c0_41 = arith.constant 0 : index
      %c0_42 = arith.constant 0 : index
      %60 = vector.load %arg14[%c0_41, %c0_42] : memref<8x32xf32, #tpu.memory_space<vmem>>, vector<8x32xf32>
      tpu.vector_store %arg14[%c0_41, %c0_42], %59 {strides = array<i32>} : memref<8x32xf32, #tpu.memory_space<vmem>>, vector<8x32xf32>,
    } else {
    }
    %c0 = arith.constant 0 : index
    %c0_1 = arith.constant 0 : index
    %c0_2 = arith.constant 0 : index
    %3 = vector.load %arg3[%c0, %c0_1, %c0_2] : memref<1x8x32xf32, #tpu.memory_space<vmem>>, vector<1x8x32xf32>
    %4 = vector.shape_cast %3 : vector<1x8x32xf32> to vector<8x32xf32>
    %5 = arith.truncf %4 : vector<8x32xf32> to vector<8x32xbf16>
    %c0_3 = arith.constant 0 : index
    %c0_4 = arith.constant 0 : index
    %c0_5 = arith.constant 0 : index
    %6 = vector.load %arg4[%c0_3, %c0_4, %c0_5] : memref<1x32x8xbf16, #tpu.memory_space<vmem>>, vector<1x32x8xbf16>
    %7 = vector.shape_cast %6 : vector<1x32x8xbf16> to vector<32x8xbf16>
    %cst = arith.constant dense<0.000000e+00> : vector<8x8xf32>
    %8 = tpu.matmul %5, %7, %cst {dimension_numbers = #tpu.dot_dimension_numbers<[1], [0], [0], [1], [0, 0, 1, 1], [], []>} : vector<8x32xbf16>, vector<32x8xbf16>, vector<8x8xf32> -> vector<8x8xf32>
    %c0_6 = arith.constant 0 : index
    %c0_7 = arith.constant 0 : index
    %c0_8 = arith.constant 0 : index
    %9 = vector.load %arg7[%c0_6, %c0_7, %c0_8] : memref<1x1x8xf32, #tpu.memory_space<vmem>>, vector<1x1x8xf32>
    %10 = vector.shape_cast %9 : vector<1x1x8xf32> to vector<1x8xf32>
    %11 = vector.broadcast %10 : vector<1x8xf32> to vector<8x8xf32>
    %12 = arith.addf %8, %11 : vector<8x8xf32>
    %c0_9 = arith.constant 0 : index
    %c0_10 = arith.constant 0 : index
    %c0_11 = arith.constant 0 : index
    %13 = vector.load %arg5[%c0_9, %c0_10, %c0_11] : memref<1x32x8xbf16, #tpu.memory_space<vmem>>, vector<1x32x8xbf16>
    %14 = vector.shape_cast %13 : vector<1x32x8xbf16> to vector<32x8xbf16>
    %cst_12 = arith.constant dense<0.000000e+00> : vector<8x8xf32>
    %15 = tpu.matmul %5, %14, %cst_12 {dimension_numbers = #tpu.dot_dimension_numbers<[1], [0], [0], [1], [0, 0, 1, 1], [], []>} : vector<8x32xbf16>, vector<32x8xbf16>, vector<8x8xf32> -> vector<8x8xf32>
    %c0_13 = arith.constant 0 : index
    %c0_14 = arith.constant 0 : index
    %c0_15 = arith.constant 0 : index
    %16 = vector.load %arg8[%c0_13, %c0_14, %c0_15] : memref<1x1x8xf32, #tpu.memory_space<vmem>>, vector<1x1x8xf32>
    %17 = vector.shape_cast %16 : vector<1x1x8xf32> to vector<1x8xf32>
    %18 = vector.broadcast %17 : vector<1x8xf32> to vector<8x8xf32>
    %19 = arith.addf %15, %18 : vector<8x8xf32>
    %c0_16 = arith.constant 0 : index
    %c0_17 = arith.constant 0 : index
    %c0_18 = arith.constant 0 : index
    %20 = vector.load %arg6[%c0_16, %c0_17, %c0_18] : memref<1x32x8xbf16, #tpu.memory_space<vmem>>, vector<1x32x8xbf16>
    %21 = vector.shape_cast %20 : vector<1x32x8xbf16> to vector<32x8xbf16>
    %cst_19 = arith.constant dense<0.000000e+00> : vector<8x8xf32>
    %22 = tpu.matmul %5, %21, %cst_19 {dimension_numbers = #tpu.dot_dimension_numbers<[1], [0], [0], [1], [0, 0, 1, 1], [], []>} : vector<8x32xbf16>, vector<32x8xbf16>, vector<8x8xf32> -> vector<8x8xf32>
    %c0_20 = arith.constant 0 : index
    %c0_21 = arith.constant 0 : index
    %c0_22 = arith.constant 0 : index
    %23 = vector.load %arg9[%c0_20, %c0_21, %c0_22] : memref<1x1x8xf32, #tpu.memory_space<vmem>>, vector<1x1x8xf32>
    %24 = vector.shape_cast %23 : vector<1x1x8xf32> to vector<1x8xf32>
    %25 = vector.broadcast %24 : vector<1x8xf32> to vector<8x8xf32>
    %26 = arith.addf %22, %25 : vector<8x8xf32>
    %27 = arith.truncf %12 : vector<8x8xf32> to vector<8x8xbf16>
    %28 = arith.truncf %19 : vector<8x8xf32> to vector<8x8xbf16>
    %cst_23 = arith.constant dense<0.000000e+00> : vector<8x8xf32>
    %29 = tpu.matmul %27, %28, %cst_23 {dimension_numbers = #tpu.dot_dimension_numbers<[1], [1], [0], [0], [0, 0, 1, 0], [], []>} : vector<8x8xbf16>, vector<8x8xbf16>, vector<8x8xf32> -> vector<8x8xf32>
    %cst_24 = arith.constant 0.353553385 : f32
    %30 = vector.broadcast %cst_24 : f32 to vector<8x8xf32>
    %31 = arith.mulf %29, %30 : vector<8x8xf32>
    %c0_25 = arith.constant 0 : index
    %c0_26 = arith.constant 0 : index
    %c0_27 = arith.constant 0 : index
    %32 = vector.load %arg12[%c0_25, %c0_26, %c0_27] : memref<1x1x8xf32, #tpu.memory_space<vmem>>, vector<1x1x8xf32>
    %33 = vector.shape_cast %32 : vector<1x1x8xf32> to vector<1x8xf32>
    %34 = vector.broadcast %33 : vector<1x8xf32> to vector<8x8xf32>
    %35 = arith.addf %31, %34 : vector<8x8xf32>
    %cst_28 = arith.constant dense<0xFF800000> : vector<8xf32>
    %36 = vector.multi_reduction <maximumf>, %35, %cst_28 [1] : vector<8x8xf32> to vector<8xf32>
    %37 = vector.shape_cast %36 : vector<8xf32> to vector<8x1xf32>
    %38 = vector.broadcast %37 : vector<8x1xf32> to vector<8x8xf32>
    %39 = arith.subf %35, %38 : vector<8x8xf32>
    %40 = math.exp %39 : vector<8x8xf32>
    %cst_29 = arith.constant dense<0.000000e+00> : vector<8xf32>
    %41 = vector.multi_reduction <add>, %40, %cst_29 [1] : vector<8x8xf32> to vector<8xf32>
    %42 = vector.shape_cast %41 : vector<8xf32> to vector<8x1xf32>
    %43 = tpu.reciprocal %42 {approx = true} : vector<8x1xf32> -> vector<8x1xf32>
    %44 = vector.broadcast %43 : vector<8x1xf32> to vector<8x8xf32>
    %45 = arith.mulf %40, %44 : vector<8x8xf32>
    %46 = arith.truncf %45 : vector<8x8xf32> to vector<8x8xbf16>
    %47 = arith.truncf %26 : vector<8x8xf32> to vector<8x8xbf16>
    %cst_30 = arith.constant dense<0.000000e+00> : vector<8x8xf32>
    %48 = tpu.matmul %46, %47, %cst_30 {dimension_numbers = #tpu.dot_dimension_numbers<[1], [0], [0], [1], [0, 0, 1, 1], [], []>} : vector<8x8xbf16>, vector<8x8xbf16>, vector<8x8xf32> -> vector<8x8xf32>
    %c0_31 = arith.constant 0 : index
    %c0_32 = arith.constant 0 : index
    %49 = vector.load %arg14[%c0_31, %c0_32] : memref<8x32xf32, #tpu.memory_space<vmem>>, vector<8x32xf32>
    %50 = arith.truncf %48 : vector<8x8xf32> to vector<8x8xbf16>
    %c0_33 = arith.constant 0 : index
    %c0_34 = arith.constant 0 : index
    %c0_35 = arith.constant 0 : index
    %51 = vector.load %arg10[%c0_33, %c0_34, %c0_35] : memref<1x8x32xbf16, #tpu.memory_space<vmem>>, vector<1x8x32xbf16>
    %52 = vector.shape_cast %51 : vector<1x8x32xbf16> to vector<8x32xbf16>
    %cst_36 = arith.constant dense<0.000000e+00> : vector<8x32xf32>
    %53 = tpu.matmul %50, %52, %cst_36 {dimension_numbers = #tpu.dot_dimension_numbers<[1], [0], [0], [1], [0, 0, 1, 1], [], []>} : vector<8x8xbf16>, vector<8x32xbf16>, vector<8x32xf32> -> vector<8x32xf32>
    %54 = arith.addf %49, %53 : vector<8x32xf32>
    %c0_37 = arith.constant 0 : index
    %c0_38 = arith.constant 0 : index
    %55 = vector.load %arg14[%c0_37, %c0_38] : memref<8x32xf32, #tpu.memory_space<vmem>>, vector<8x32xf32>
    tpu.vector_store %arg14[%c0_37, %c0_38], %54 {strides = array<i32>} : memref<8x32xf32, #tpu.memory_space<vmem>>, vector<8x32xf32>,
    %c3_i32 = arith.constant 3 : i32
    %56 = arith.cmpi eq, %arg2, %c3_i32 : i32
    %57 = arith.extui %56 : i1 to i32
    %c0_i32_39 = arith.constant 0 : i32
    %58 = arith.cmpi ne, %57, %c0_i32_39 : i32
    scf.if %58 {
      %c0_40 = arith.constant 0 : index
      %c0_41 = arith.constant 0 : index
      %59 = vector.load %arg14[%c0_40, %c0_41] : memref<8x32xf32, #tpu.memory_space<vmem>>, vector<8x32xf32>
      %c0_42 = arith.constant 0 : index
      %c0_43 = arith.constant 0 : index
      %60 = vector.load %arg11[%c0_42, %c0_43] : memref<1x32xf32, #tpu.memory_space<vmem>>, vector<1x32xf32>
      %61 = vector.broadcast %60 : vector<1x32xf32> to vector<8x32xf32>
      %62 = arith.addf %59, %61 : vector<8x32xf32>
      %c0_44 = arith.constant 0 : index
      %c0_45 = arith.constant 0 : index
      %c0_46 = arith.constant 0 : index
      %63 = vector.load %arg13[%c0_44, %c0_45, %c0_46] : memref<1x8x32xf32, #tpu.memory_space<vmem>>, vector<1x8x32xf32>
      %64 = vector.shape_cast %63 : vector<1x8x32xf32> to vector<8x32xf32>
      %65 = vector.shape_cast %62 : vector<8x32xf32> to vector<1x8x32xf32>
      tpu.vector_store %arg13[%c0_44, %c0_45, %c0_46], %65 {strides = array<i32>} : memref<1x8x32xf32, #tpu.memory_space<vmem>>, vector<1x8x32xf32>,
    } else {
    }
    return
  }
  func.func @transform_0(%arg0: i32, %arg1: i32, %arg2: i32) -> (i32, i32, i32) {
    %c0_i32 = arith.constant 0 : i32
    %c0_i32_0 = arith.constant 0 : i32
    %c0_i32_1 = arith.constant 0 : i32
    return %arg0, %c0_i32, %c0_i32_0 : i32, i32, i32
  }
  func.func @transform_1(%arg0: i32, %arg1: i32, %arg2: i32) -> (i32, i32, i32) {
    %c0_i32 = arith.constant 0 : i32
    %c0_i32_0 = arith.constant 0 : i32
    %c0_i32_1 = arith.constant 0 : i32
    return %arg2, %c0_i32, %c0_i32_0 : i32, i32, i32
  }
  func.func @transform_2(%arg0: i32, %arg1: i32, %arg2: i32) -> (i32, i32, i32) {
    %c0_i32 = arith.constant 0 : i32
    %c0_i32_0 = arith.constant 0 : i32
    %c0_i32_1 = arith.constant 0 : i32
    return %arg2, %c0_i32, %c0_i32_0 : i32, i32, i32
  }
  func.func @transform_3(%arg0: i32, %arg1: i32, %arg2: i32) -> (i32, i32, i32) {
    %c0_i32 = arith.constant 0 : i32
    %c0_i32_0 = arith.constant 0 : i32
    %c0_i32_1 = arith.constant 0 : i32
    return %arg2, %c0_i32, %c0_i32_0 : i32, i32, i32
  }
  func.func @transform_4(%arg0: i32, %arg1: i32, %arg2: i32) -> (i32, i32, i32) {
    %c0_i32 = arith.constant 0 : i32
    %c0_i32_0 = arith.constant 0 : i32
    %c0_i32_1 = arith.constant 0 : i32
    return %arg2, %c0_i32, %c0_i32_0 : i32, i32, i32
  }
  func.func @transform_5(%arg0: i32, %arg1: i32, %arg2: i32) -> (i32, i32, i32) {
    %c0_i32 = arith.constant 0 : i32
    %c0_i32_0 = arith.constant 0 : i32
    %c0_i32_1 = arith.constant 0 : i32
    return %arg2, %c0_i32, %c0_i32_0 : i32, i32, i32
  }
  func.func @transform_6(%arg0: i32, %arg1: i32, %arg2: i32) -> (i32, i32, i32) {
    %c0_i32 = arith.constant 0 : i32
    %c0_i32_0 = arith.constant 0 : i32
    %c0_i32_1 = arith.constant 0 : i32
    return %arg2, %c0_i32, %c0_i32_0 : i32, i32, i32
  }
  func.func @transform_7(%arg0: i32, %arg1: i32, %arg2: i32) -> (i32, i32, i32) {
    %c0_i32 = arith.constant 0 : i32
    %c0_i32_0 = arith.constant 0 : i32
    %c0_i32_1 = arith.constant 0 : i32
    return %arg2, %c0_i32, %c0_i32_0 : i32, i32, i32
  }
  func.func @transform_8(%arg0: i32, %arg1: i32, %arg2: i32) -> (i32, i32) {
    %c0_i32 = arith.constant 0 : i32
    %c0_i32_0 = arith.constant 0 : i32
    %c0_i32_1 = arith.constant 0 : i32
    return %c0_i32, %c0_i32_0 : i32, i32
  }
  func.func @transform_9(%arg0: i32, %arg1: i32, %arg2: i32) -> (i32, i32, i32) {
    %c0_i32 = arith.constant 0 : i32
    %c0_i32_0 = arith.constant 0 : i32
    %c0_i32_1 = arith.constant 0 : i32
    return %arg0, %c0_i32, %c0_i32_0 : i32, i32, i32
  }
  func.func @transform_10(%arg0: i32, %arg1: i32, %arg2: i32) -> (i32, i32, i32) {
    %c0_i32 = arith.constant 0 : i32
    %c0_i32_0 = arith.constant 0 : i32
    return %arg0, %arg1, %c0_i32 : i32, i32, i32
  }
}

module attributes {stable_mosaic.version = 11 : i64} {
  func.func @embed_ln_kernel(%arg0: i32, %arg1: memref<16x32xf32, #tpu.memory_space<vmem>>, %arg2: memref<16x32xf32, #tpu.memory_space<vmem>>, %arg3: memref<1x32xf32, #tpu.memory_space<vmem>>, %arg4: memref<1x32xf32, #tpu.memory_space<vmem>>, %arg5: memref<16x32xf32, #tpu.memory_space<vmem>>) attributes {dimension_semantics = [#tpu.dimension_semantics<parallel>], iteration_bounds = array<i64: 1>, scalar_prefetch = 0 : i64, scratch_operands = 0 : i64, tpu.core_type = #tpu.core_type<tc>, window_params = [{transform_indices = @transform_0, window_bounds = array<i64: 16, 32>}, {transform_indices = @transform_1, window_bounds = array<i64: 16, 32>}, {pipeline_mode = #tpu.pipeline_mode<synchronous>, transform_indices = @transform_2, window_bounds = array<i64: 1, 32>}, {pipeline_mode = #tpu.pipeline_mode<synchronous>, transform_indices = @transform_3, window_bounds = array<i64: 1, 32>}, {transform_indices = @transform_4, window_bounds = array<i64: 16, 32>}]} {
    %c0 = arith.constant 0 : index
    %c0_0 = arith.constant 0 : index
    %0 = vector.load %arg1[%c0, %c0_0] : memref<16x32xf32, #tpu.memory_space<vmem>>, vector<16x32xf32>
    %c0_1 = arith.constant 0 : index
    %c0_2 = arith.constant 0 : index
    %1 = vector.load %arg2[%c0_1, %c0_2] : memref<16x32xf32, #tpu.memory_space<vmem>>, vector<16x32xf32>
    %2 = arith.addf %0, %1 : vector<16x32xf32>
    %c0_3 = arith.constant 0 : index
    %c0_4 = arith.constant 0 : index
    %3 = vector.load %arg3[%c0_3, %c0_4] : memref<1x32xf32, #tpu.memory_space<vmem>>, vector<1x32xf32>
    %c0_5 = arith.constant 0 : index
    %c0_6 = arith.constant 0 : index
    %4 = vector.load %arg4[%c0_5, %c0_6] : memref<1x32xf32, #tpu.memory_space<vmem>>, vector<1x32xf32>
    %cst = arith.constant dense<0.000000e+00> : vector<16xf32>
    %5 = vector.multi_reduction <add>, %2, %cst [1] : vector<16x32xf32> to vector<16xf32>
    %6 = vector.shape_cast %5 : vector<16xf32> to vector<16x1xf32>
    %cst_7 = arith.constant 3.200000e+01 : f32
    %7 = vector.broadcast %cst_7 : f32 to vector<16x1xf32>
    %8 = arith.divf %6, %7 : vector<16x1xf32>
    %9 = vector.broadcast %8 : vector<16x1xf32> to vector<16x32xf32>
    %10 = arith.subf %2, %9 : vector<16x32xf32>
    %11 = arith.mulf %10, %10 : vector<16x32xf32>
    %cst_8 = arith.constant dense<0.000000e+00> : vector<16xf32>
    %12 = vector.multi_reduction <add>, %11, %cst_8 [1] : vector<16x32xf32> to vector<16xf32>
    %13 = vector.shape_cast %12 : vector<16xf32> to vector<16x1xf32>
    %cst_9 = arith.constant 3.200000e+01 : f32
    %14 = vector.broadcast %cst_9 : f32 to vector<16x1xf32>
    %15 = arith.divf %13, %14 : vector<16x1xf32>
    %16 = vector.broadcast %8 : vector<16x1xf32> to vector<16x32xf32>
    %17 = arith.subf %2, %16 : vector<16x32xf32>
    %cst_10 = arith.constant 9.99999974E-6 : f32
    %18 = vector.broadcast %cst_10 : f32 to vector<16x1xf32>
    %19 = arith.addf %15, %18 : vector<16x1xf32>
    %20 = math.rsqrt %19 : vector<16x1xf32>
    %21 = vector.broadcast %20 : vector<16x1xf32> to vector<16x32xf32>
    %22 = arith.mulf %17, %21 : vector<16x32xf32>
    %23 = vector.broadcast %3 : vector<1x32xf32> to vector<16x32xf32>
    %24 = arith.mulf %22, %23 : vector<16x32xf32>
    %25 = vector.broadcast %4 : vector<1x32xf32> to vector<16x32xf32>
    %26 = arith.addf %24, %25 : vector<16x32xf32>
    %c0_11 = arith.constant 0 : index
    %c0_12 = arith.constant 0 : index
    %27 = vector.load %arg5[%c0_11, %c0_12] : memref<16x32xf32, #tpu.memory_space<vmem>>, vector<16x32xf32>
    tpu.vector_store %arg5[%c0_11, %c0_12], %26 {strides = array<i32>} : memref<16x32xf32, #tpu.memory_space<vmem>>, vector<16x32xf32>,
    return
  }
  func.func @transform_0(%arg0: i32) -> (i32, i32) {
    %c0_i32 = arith.constant 0 : i32
    %c0_i32_0 = arith.constant 0 : i32
    return %arg0, %c0_i32 : i32, i32
  }
  func.func @transform_1(%arg0: i32) -> (i32, i32) {
    %c0_i32 = arith.constant 0 : i32
    %c0_i32_0 = arith.constant 0 : i32
    return %arg0, %c0_i32 : i32, i32
  }
  func.func @transform_2(%arg0: i32) -> (i32, i32) {
    %c0_i32 = arith.constant 0 : i32
    %c0_i32_0 = arith.constant 0 : i32
    %c0_i32_1 = arith.constant 0 : i32
    return %c0_i32, %c0_i32_0 : i32, i32
  }
  func.func @transform_3(%arg0: i32) -> (i32, i32) {
    %c0_i32 = arith.constant 0 : i32
    %c0_i32_0 = arith.constant 0 : i32
    %c0_i32_1 = arith.constant 0 : i32
    return %c0_i32, %c0_i32_0 : i32, i32
  }
  func.func @transform_4(%arg0: i32) -> (i32, i32) {
    %c0_i32 = arith.constant 0 : i32
    %c0_i32_0 = arith.constant 0 : i32
    return %arg0, %c0_i32 : i32, i32
  }
}

module attributes {stable_mosaic.version = 11 : i64} {
  func.func @ffn_tail_kernel(%arg0: i32, %arg1: i32, %arg2: memref<16x32xf32, #tpu.memory_space<vmem>>, %arg3: memref<16x32xf32, #tpu.memory_space<vmem>>, %arg4: memref<1x32xf32, #tpu.memory_space<vmem>>, %arg5: memref<1x32xf32, #tpu.memory_space<vmem>>, %arg6: memref<32x64xbf16, #tpu.memory_space<vmem>>, %arg7: memref<1x64xf32, #tpu.memory_space<vmem>>, %arg8: memref<64x32xbf16, #tpu.memory_space<vmem>>, %arg9: memref<1x32xf32, #tpu.memory_space<vmem>>, %arg10: memref<1x32xf32, #tpu.memory_space<vmem>>, %arg11: memref<1x32xf32, #tpu.memory_space<vmem>>, %arg12: memref<16x32xf32, #tpu.memory_space<vmem>>, %arg13: memref<16x32xf32, #tpu.memory_space<vmem>>, %arg14: memref<16x32xf32, #tpu.memory_space<vmem>>) attributes {dimension_semantics = [#tpu.dimension_semantics<parallel>, #tpu.dimension_semantics<arbitrary>], iteration_bounds = array<i64: 1, 1>, scalar_prefetch = 0 : i64, scratch_operands = 2 : i64, tpu.core_type = #tpu.core_type<tc>, window_params = [{transform_indices = @transform_0, window_bounds = array<i64: 16, 32>}, {transform_indices = @transform_1, window_bounds = array<i64: 16, 32>}, {pipeline_mode = #tpu.pipeline_mode<synchronous>, transform_indices = @transform_2, window_bounds = array<i64: 1, 32>}, {pipeline_mode = #tpu.pipeline_mode<synchronous>, transform_indices = @transform_3, window_bounds = array<i64: 1, 32>}, {transform_indices = @transform_4, window_bounds = array<i64: 32, 64>}, {transform_indices = @transform_5, window_bounds = array<i64: 1, 64>}, {transform_indices = @transform_6, window_bounds = array<i64: 64, 32>}, {pipeline_mode = #tpu.pipeline_mode<synchronous>, transform_indices = @transform_7, window_bounds = array<i64: 1, 32>}, {pipeline_mode = #tpu.pipeline_mode<synchronous>, transform_indices = @transform_8, window_bounds = array<i64: 1, 32>}, {pipeline_mode = #tpu.pipeline_mode<synchronous>, transform_indices = @transform_9, window_bounds = array<i64: 1, 32>}, {transform_indices = @transform_10, window_bounds = array<i64: 16, 32>}]} {
    %c0_i32 = arith.constant 0 : i32
    %0 = arith.cmpi eq, %arg1, %c0_i32 : i32
    %1 = arith.extui %0 : i1 to i32
    %c0_i32_0 = arith.constant 0 : i32
    %2 = arith.cmpi ne, %1, %c0_i32_0 : i32
    scf.if %2 {
      %c0_30 = arith.constant 0 : index
      %c0_31 = arith.constant 0 : index
      %59 = vector.load %arg3[%c0_30, %c0_31] : memref<16x32xf32, #tpu.memory_space<vmem>>, vector<16x32xf32>
      %c0_32 = arith.constant 0 : index
      %c0_33 = arith.constant 0 : index
      %60 = vector.load %arg2[%c0_32, %c0_33] : memref<16x32xf32, #tpu.memory_space<vmem>>, vector<16x32xf32>
      %61 = arith.addf %59, %60 : vector<16x32xf32>
      %c0_34 = arith.constant 0 : index
      %c0_35 = arith.constant 0 : index
      %62 = vector.load %arg4[%c0_34, %c0_35] : memref<1x32xf32, #tpu.memory_space<vmem>>, vector<1x32xf32>
      %c0_36 = arith.constant 0 : index
      %c0_37 = arith.constant 0 : index
      %63 = vector.load %arg5[%c0_36, %c0_37] : memref<1x32xf32, #tpu.memory_space<vmem>>, vector<1x32xf32>
      %cst_38 = arith.constant dense<0.000000e+00> : vector<16xf32>
      %64 = vector.multi_reduction <add>, %61, %cst_38 [1] : vector<16x32xf32> to vector<16xf32>
      %65 = vector.shape_cast %64 : vector<16xf32> to vector<16x1xf32>
      %cst_39 = arith.constant 3.200000e+01 : f32
      %66 = vector.broadcast %cst_39 : f32 to vector<16x1xf32>
      %67 = arith.divf %65, %66 : vector<16x1xf32>
      %68 = vector.broadcast %67 : vector<16x1xf32> to vector<16x32xf32>
      %69 = arith.subf %61, %68 : vector<16x32xf32>
      %70 = arith.mulf %69, %69 : vector<16x32xf32>
      %cst_40 = arith.constant dense<0.000000e+00> : vector<16xf32>
      %71 = vector.multi_reduction <add>, %70, %cst_40 [1] : vector<16x32xf32> to vector<16xf32>
      %72 = vector.shape_cast %71 : vector<16xf32> to vector<16x1xf32>
      %cst_41 = arith.constant 3.200000e+01 : f32
      %73 = vector.broadcast %cst_41 : f32 to vector<16x1xf32>
      %74 = arith.divf %72, %73 : vector<16x1xf32>
      %75 = vector.broadcast %67 : vector<16x1xf32> to vector<16x32xf32>
      %76 = arith.subf %61, %75 : vector<16x32xf32>
      %cst_42 = arith.constant 9.99999974E-6 : f32
      %77 = vector.broadcast %cst_42 : f32 to vector<16x1xf32>
      %78 = arith.addf %74, %77 : vector<16x1xf32>
      %79 = math.rsqrt %78 : vector<16x1xf32>
      %80 = vector.broadcast %79 : vector<16x1xf32> to vector<16x32xf32>
      %81 = arith.mulf %76, %80 : vector<16x32xf32>
      %82 = vector.broadcast %62 : vector<1x32xf32> to vector<16x32xf32>
      %83 = arith.mulf %81, %82 : vector<16x32xf32>
      %84 = vector.broadcast %63 : vector<1x32xf32> to vector<16x32xf32>
      %85 = arith.addf %83, %84 : vector<16x32xf32>
      %c0_43 = arith.constant 0 : index
      %c0_44 = arith.constant 0 : index
      %86 = vector.load %arg13[%c0_43, %c0_44] : memref<16x32xf32, #tpu.memory_space<vmem>>, vector<16x32xf32>
      tpu.vector_store %arg13[%c0_43, %c0_44], %85 {strides = array<i32>} : memref<16x32xf32, #tpu.memory_space<vmem>>, vector<16x32xf32>,
      %cst_45 = arith.constant 0.000000e+00 : f32
      %87 = vector.broadcast %cst_45 : f32 to vector<16x32xf32>
      %c0_46 = arith.constant 0 : index
      %c0_47 = arith.constant 0 : index
      %88 = vector.load %arg14[%c0_46, %c0_47] : memref<16x32xf32, #tpu.memory_space<vmem>>, vector<16x32xf32>
      tpu.vector_store %arg14[%c0_46, %c0_47], %87 {strides = array<i32>} : memref<16x32xf32, #tpu.memory_space<vmem>>, vector<16x32xf32>,
    } else {
    }
    %c0 = arith.constant 0 : index
    %c0_1 = arith.constant 0 : index
    %3 = vector.load %arg13[%c0, %c0_1] : memref<16x32xf32, #tpu.memory_space<vmem>>, vector<16x32xf32>
    %4 = arith.truncf %3 : vector<16x32xf32> to vector<16x32xbf16>
    %c0_2 = arith.constant 0 : index
    %c0_3 = arith.constant 0 : index
    %5 = vector.load %arg6[%c0_2, %c0_3] : memref<32x64xbf16, #tpu.memory_space<vmem>>, vector<32x64xbf16>
    %cst = arith.constant dense<0.000000e+00> : vector<16x64xf32>
    %6 = tpu.matmul %4, %5, %cst {dimension_numbers = #tpu.dot_dimension_numbers<[1], [0], [0], [1], [0, 0, 1, 1], [], []>} : vector<16x32xbf16>, vector<32x64xbf16>, vector<16x64xf32> -> vector<16x64xf32>
    %c0_4 = arith.constant 0 : index
    %c0_5 = arith.constant 0 : index
    %7 = vector.load %arg7[%c0_4, %c0_5] : memref<1x64xf32, #tpu.memory_space<vmem>>, vector<1x64xf32>
    %8 = vector.broadcast %7 : vector<1x64xf32> to vector<16x64xf32>
    %9 = arith.addf %6, %8 : vector<16x64xf32>
    %cst_6 = arith.constant 5.000000e-01 : f32
    %10 = vector.broadcast %cst_6 : f32 to vector<16x64xf32>
    %11 = arith.mulf %10, %9 : vector<16x64xf32>
    %cst_7 = arith.constant 0.707106769 : f32
    %12 = vector.broadcast %cst_7 : f32 to vector<16x64xf32>
    %13 = arith.mulf %9, %12 : vector<16x64xf32>
    %14 = math.absf %13 : vector<16x64xf32>
    %cst_8 = arith.constant 0.327591091 : f32
    %15 = vector.broadcast %cst_8 : f32 to vector<16x64xf32>
    %16 = arith.mulf %15, %14 : vector<16x64xf32>
    %cst_9 = arith.constant 1.000000e+00 : f32
    %17 = vector.broadcast %cst_9 : f32 to vector<16x64xf32>
    %18 = arith.addf %17, %16 : vector<16x64xf32>
    %cst_10 = arith.constant 1.000000e+00 : f32
    %19 = vector.broadcast %cst_10 : f32 to vector<16x64xf32>
    %20 = arith.divf %19, %18 : vector<16x64xf32>
    %cst_11 = arith.constant 1.06140542 : f32
    %21 = vector.broadcast %cst_11 : f32 to vector<16x64xf32>
    %22 = arith.mulf %21, %20 : vector<16x64xf32>
    %cst_12 = arith.constant -1.45315206 : f32
    %23 = vector.broadcast %cst_12 : f32 to vector<16x64xf32>
    %24 = arith.addf %22, %23 : vector<16x64xf32>
    %25 = arith.mulf %24, %20 : vector<16x64xf32>
    %cst_13 = arith.constant 1.42141378 : f32
    %26 = vector.broadcast %cst_13 : f32 to vector<16x64xf32>
    %27 = arith.addf %25, %26 : vector<16x64xf32>
    %28 = arith.mulf %27, %20 : vector<16x64xf32>
    %cst_14 = arith.constant -0.284496725 : f32
    %29 = vector.broadcast %cst_14 : f32 to vector<16x64xf32>
    %30 = arith.addf %28, %29 : vector<16x64xf32>
    %31 = arith.mulf %30, %20 : vector<16x64xf32>
    %cst_15 = arith.constant 0.254829586 : f32
    %32 = vector.broadcast %cst_15 : f32 to vector<16x64xf32>
    %33 = arith.addf %31, %32 : vector<16x64xf32>
    %34 = arith.mulf %33, %20 : vector<16x64xf32>
    %cst_16 = arith.constant 0.000000e+00 : f32
    %35 = vector.broadcast %cst_16 : f32 to vector<16x64xf32>
    %36 = arith.subf %35, %14 : vector<16x64xf32>
    %37 = arith.mulf %36, %14 : vector<16x64xf32>
    %38 = math.exp %37 : vector<16x64xf32>
    %39 = arith.mulf %34, %38 : vector<16x64xf32>
    %cst_17 = arith.constant 1.000000e+00 : f32
    %40 = vector.broadcast %cst_17 : f32 to vector<16x64xf32>
    %41 = arith.subf %40, %39 : vector<16x64xf32>
    %cst_18 = arith.constant 0.000000e+00 : f32
    %42 = vector.broadcast %cst_18 : f32 to vector<16x64xf32>
    %43 = arith.cmpf olt, %13, %42 : vector<16x64xf32>
    %cst_19 = arith.constant 0.000000e+00 : f32
    %44 = vector.broadcast %cst_19 : f32 to vector<16x64xf32>
    %45 = arith.subf %44, %41 : vector<16x64xf32>
    %46 = arith.select %43, %45, %41 : vector<16x64xi1>, vector<16x64xf32>
    %cst_20 = arith.constant 1.000000e+00 : f32
    %47 = vector.broadcast %cst_20 : f32 to vector<16x64xf32>
    %48 = arith.addf %47, %46 : vector<16x64xf32>
    %49 = arith.mulf %11, %48 : vector<16x64xf32>
    %c0_21 = arith.constant 0 : index
    %c0_22 = arith.constant 0 : index
    %50 = vector.load %arg14[%c0_21, %c0_22] : memref<16x32xf32, #tpu.memory_space<vmem>>, vector<16x32xf32>
    %51 = arith.truncf %49 : vector<16x64xf32> to vector<16x64xbf16>
    %c0_23 = arith.constant 0 : index
    %c0_24 = arith.constant 0 : index
    %52 = vector.load %arg8[%c0_23, %c0_24] : memref<64x32xbf16, #tpu.memory_space<vmem>>, vector<64x32xbf16>
    %cst_25 = arith.constant dense<0.000000e+00> : vector<16x32xf32>
    %53 = tpu.matmul %51, %52, %cst_25 {dimension_numbers = #tpu.dot_dimension_numbers<[1], [0], [0], [1], [0, 0, 1, 1], [], []>} : vector<16x64xbf16>, vector<64x32xbf16>, vector<16x32xf32> -> vector<16x32xf32>
    %54 = arith.addf %50, %53 : vector<16x32xf32>
    %c0_26 = arith.constant 0 : index
    %c0_27 = arith.constant 0 : index
    %55 = vector.load %arg14[%c0_26, %c0_27] : memref<16x32xf32, #tpu.memory_space<vmem>>, vector<16x32xf32>
    tpu.vector_store %arg14[%c0_26, %c0_27], %54 {strides = array<i32>} : memref<16x32xf32, #tpu.memory_space<vmem>>, vector<16x32xf32>,
    %c0_i32_28 = arith.constant 0 : i32
    %56 = arith.cmpi eq, %arg1, %c0_i32_28 : i32
    %57 = arith.extui %56 : i1 to i32
    %c0_i32_29 = arith.constant 0 : i32
    %58 = arith.cmpi ne, %57, %c0_i32_29 : i32
    scf.if %58 {
      %c0_30 = arith.constant 0 : index
      %c0_31 = arith.constant 0 : index
      %59 = vector.load %arg13[%c0_30, %c0_31] : memref<16x32xf32, #tpu.memory_space<vmem>>, vector<16x32xf32>
      %c0_32 = arith.constant 0 : index
      %c0_33 = arith.constant 0 : index
      %60 = vector.load %arg14[%c0_32, %c0_33] : memref<16x32xf32, #tpu.memory_space<vmem>>, vector<16x32xf32>
      %61 = arith.addf %59, %60 : vector<16x32xf32>
      %c0_34 = arith.constant 0 : index
      %c0_35 = arith.constant 0 : index
      %62 = vector.load %arg9[%c0_34, %c0_35] : memref<1x32xf32, #tpu.memory_space<vmem>>, vector<1x32xf32>
      %63 = vector.broadcast %62 : vector<1x32xf32> to vector<16x32xf32>
      %64 = arith.addf %61, %63 : vector<16x32xf32>
      %c0_36 = arith.constant 0 : index
      %c0_37 = arith.constant 0 : index
      %65 = vector.load %arg10[%c0_36, %c0_37] : memref<1x32xf32, #tpu.memory_space<vmem>>, vector<1x32xf32>
      %c0_38 = arith.constant 0 : index
      %c0_39 = arith.constant 0 : index
      %66 = vector.load %arg11[%c0_38, %c0_39] : memref<1x32xf32, #tpu.memory_space<vmem>>, vector<1x32xf32>
      %cst_40 = arith.constant dense<0.000000e+00> : vector<16xf32>
      %67 = vector.multi_reduction <add>, %64, %cst_40 [1] : vector<16x32xf32> to vector<16xf32>
      %68 = vector.shape_cast %67 : vector<16xf32> to vector<16x1xf32>
      %cst_41 = arith.constant 3.200000e+01 : f32
      %69 = vector.broadcast %cst_41 : f32 to vector<16x1xf32>
      %70 = arith.divf %68, %69 : vector<16x1xf32>
      %71 = vector.broadcast %70 : vector<16x1xf32> to vector<16x32xf32>
      %72 = arith.subf %64, %71 : vector<16x32xf32>
      %73 = arith.mulf %72, %72 : vector<16x32xf32>
      %cst_42 = arith.constant dense<0.000000e+00> : vector<16xf32>
      %74 = vector.multi_reduction <add>, %73, %cst_42 [1] : vector<16x32xf32> to vector<16xf32>
      %75 = vector.shape_cast %74 : vector<16xf32> to vector<16x1xf32>
      %cst_43 = arith.constant 3.200000e+01 : f32
      %76 = vector.broadcast %cst_43 : f32 to vector<16x1xf32>
      %77 = arith.divf %75, %76 : vector<16x1xf32>
      %78 = vector.broadcast %70 : vector<16x1xf32> to vector<16x32xf32>
      %79 = arith.subf %64, %78 : vector<16x32xf32>
      %cst_44 = arith.constant 9.99999974E-6 : f32
      %80 = vector.broadcast %cst_44 : f32 to vector<16x1xf32>
      %81 = arith.addf %77, %80 : vector<16x1xf32>
      %82 = math.rsqrt %81 : vector<16x1xf32>
      %83 = vector.broadcast %82 : vector<16x1xf32> to vector<16x32xf32>
      %84 = arith.mulf %79, %83 : vector<16x32xf32>
      %85 = vector.broadcast %65 : vector<1x32xf32> to vector<16x32xf32>
      %86 = arith.mulf %84, %85 : vector<16x32xf32>
      %87 = vector.broadcast %66 : vector<1x32xf32> to vector<16x32xf32>
      %88 = arith.addf %86, %87 : vector<16x32xf32>
      %c0_45 = arith.constant 0 : index
      %c0_46 = arith.constant 0 : index
      %89 = vector.load %arg12[%c0_45, %c0_46] : memref<16x32xf32, #tpu.memory_space<vmem>>, vector<16x32xf32>
      tpu.vector_store %arg12[%c0_45, %c0_46], %88 {strides = array<i32>} : memref<16x32xf32, #tpu.memory_space<vmem>>, vector<16x32xf32>,
    } else {
    }
    return
  }
  func.func @transform_0(%arg0: i32, %arg1: i32) -> (i32, i32) {
    %c0_i32 = arith.constant 0 : i32
    %c0_i32_0 = arith.constant 0 : i32
    return %arg0, %c0_i32 : i32, i32
  }
  func.func @transform_1(%arg0: i32, %arg1: i32) -> (i32, i32) {
    %c0_i32 = arith.constant 0 : i32
    %c0_i32_0 = arith.constant 0 : i32
    return %arg0, %c0_i32 : i32, i32
  }
  func.func @transform_2(%arg0: i32, %arg1: i32) -> (i32, i32) {
    %c0_i32 = arith.constant 0 : i32
    %c0_i32_0 = arith.constant 0 : i32
    %c0_i32_1 = arith.constant 0 : i32
    return %c0_i32, %c0_i32_0 : i32, i32
  }
  func.func @transform_3(%arg0: i32, %arg1: i32) -> (i32, i32) {
    %c0_i32 = arith.constant 0 : i32
    %c0_i32_0 = arith.constant 0 : i32
    %c0_i32_1 = arith.constant 0 : i32
    return %c0_i32, %c0_i32_0 : i32, i32
  }
  func.func @transform_4(%arg0: i32, %arg1: i32) -> (i32, i32) {
    %c0_i32 = arith.constant 0 : i32
    %c0_i32_0 = arith.constant 0 : i32
    return %c0_i32, %arg1 : i32, i32
  }
  func.func @transform_5(%arg0: i32, %arg1: i32) -> (i32, i32) {
    %c0_i32 = arith.constant 0 : i32
    %c0_i32_0 = arith.constant 0 : i32
    return %c0_i32, %arg1 : i32, i32
  }
  func.func @transform_6(%arg0: i32, %arg1: i32) -> (i32, i32) {
    %c0_i32 = arith.constant 0 : i32
    %c0_i32_0 = arith.constant 0 : i32
    return %arg1, %c0_i32 : i32, i32
  }
  func.func @transform_7(%arg0: i32, %arg1: i32) -> (i32, i32) {
    %c0_i32 = arith.constant 0 : i32
    %c0_i32_0 = arith.constant 0 : i32
    %c0_i32_1 = arith.constant 0 : i32
    return %c0_i32, %c0_i32_0 : i32, i32
  }
  func.func @transform_8(%arg0: i32, %arg1: i32) -> (i32, i32) {
    %c0_i32 = arith.constant 0 : i32
    %c0_i32_0 = arith.constant 0 : i32
    %c0_i32_1 = arith.constant 0 : i32
    return %c0_i32, %c0_i32_0 : i32, i32
  }
  func.func @transform_9(%arg0: i32, %arg1: i32) -> (i32, i32) {
    %c0_i32 = arith.constant 0 : i32
    %c0_i32_0 = arith.constant 0 : i32
    %c0_i32_1 = arith.constant 0 : i32
    return %c0_i32, %c0_i32_0 : i32, i32
  }
  func.func @transform_10(%arg0: i32, %arg1: i32) -> (i32, i32) {
    %c0_i32 = arith.constant 0 : i32
    %c0_i32_0 = arith.constant 0 : i32
    return %arg0, %c0_i32 : i32, i32
  }
}

</mosaic_0001>

<bundles_post_ra>
// kernel: transformer_encoder_forward.5
= control target key start
LH: loop header
LB: loop body
LE: loop exit
PB: predicated region body
PF: predicated region fallthrough
CT: control target
= control target key end

     0   :  { %vm25_vm0 = vcmask 261120   ;;  %s136_s0 = inlined_call_operand.vmem [shape: f32[16,32], index: 0, kind: input, shape index: {}]   ;;  %s137_s1 = inlined_call_operand.vmem [shape: f32[16,32], index: 1, kind: input, shape index: {}]   ;;  %s138_s2 = inlined_call_operand.vmem [shape: f32[1,32], index: 2, kind: input, shape index: {}]   ;;  %s139_s3 = inlined_call_operand.vmem [shape: f32[1,32], index: 3, kind: input, shape index: {}]   ;;  %s140_s4 = inlined_call_operand.vmem [shape: f32[16,32], index: 4, kind: output, shape index: {}]  }
   0x1   :  { %v17_v0 = vld [vmem:[%s136_s0] sm:$0xff]  ;;  %v18_v2 = vld [vmem:[%s136_s0 + $0x8] sm:$0xff] }
   0x2   :  { %v19_v1 = vld [vmem:[%s137_s1] sm:$0xff]  ;;  %v20_v4 = vld [vmem:[%s137_s1 + $0x8] sm:$0xff] }
   0x3   :  { %v21_v3 = vadd.f32 %v19_v1, %v17_v0  ;;  %v22_v5 = vadd.f32 %v20_v4, %v18_v2  ;;  %v75_v25 = vld [vmem:[%s138_s2] ss:$0 sm:$0xff] }
   0x4   :  { %v76_v27 = vld [vmem:[%s139_s3] ss:$0 sm:$0xff] }
   0x5   :  { %v26_v6 = vsel %vm25_vm0, %v21_v3, 0.0  ;;  %v29_v7 = vsel %vm25_vm0, %v22_v5, 0.0 }
   0x6   :  { %27 = vadd.xlane.f32.xlu0 %v26_v6 }
   0xa   :  { %30 = vadd.xlane.f32.xlu0 %v29_v7 }
  0x8f   :  { %v28_v8 = vpop.xlane.xlu0 %27 }
  0x90   :  { %v33_v9 = vmul.f32 0.03125, %v28_v8 }
  0x92   :  { %v35_v10 = vsub.f32 %v21_v3, %v33_v9 }
  0x93   :  { %v31_v11 = vpop.xlane.xlu0 %30 }
  0x94   :  { %v34_v12 = vmul.f32 0.03125, %v31_v11  ;;  %v37_v13 = vmul.f32 %v35_v10, %v35_v10 }
  0x96   :  { %v36_v14 = vsub.f32 %v22_v5, %v34_v12  ;;  %v39_v15 = vsel %vm25_vm0, %v37_v13, 0.0 }
  0x97   :  { %40 = vadd.xlane.f32.xlu1 %v39_v15 }
  0x98   :  { %v38_v16 = vmul.f32 %v36_v14, %v36_v14 }
  0x9a   :  { %v42_v17 = vsel %vm25_vm0, %v38_v16, 0.0 }
  0x9b   :  { %43 = vadd.xlane.f32.xlu1 %v42_v17 }
 0x120   :  { %v41_v18 = vpop.xlane.xlu1 %40 }
 0x121   :  { %v45_v19 = vmul.f32 0.03125, %v41_v18 }
 0x123   :  { %v47_v20 = vadd.f32 1e-05, %v45_v19 }
 0x124   :  { %v44_v21 = vpop.xlane.xlu1 %43 }
 0x125   :  { %77 = vrsqrt.f32 %v47_v20  ;;  %v46_v22 = vmul.f32 0.03125, %v44_v21 }
 0x127   :  { %v48_v23 = vadd.f32 1e-05, %v46_v22 }
 0x129   :  { %79 = vrsqrt.f32 %v48_v23 }
 0x132   :  { %v78_v24 = vpop.eup %77 }
 0x133   :  { %v51_v26 = vmul.f32 %v78_v24, %v35_v10 }
 0x135   :  { %v59_v28 = vmul.f32 %v75_v25, %v51_v26 }
 0x136   :  { %v80_v29 = vpop.eup %79 }
 0x137   :  { %v67_v30 = vadd.f32 %v76_v27, %v59_v28  ;;  %v52_v31 = vmul.f32 %v80_v29, %v36_v14 }
 0x139   :  { %69 = vst.msk [vmem:[%s140_s4] sm:$0xff] %vm25_vm0, %v67_v30  ;;  %v60_v32 = vmul.f32 %v75_v25, %v52_v31 }
 0x13b   :  { %v68_v33 = vadd.f32 %v76_v27, %v60_v32 }
 0x13d   :  { %70 = vst.msk [vmem:[%s140_s4 + $0x8] sm:$0xff] %vm25_vm0, %v68_v33 }

// kernel: transformer_encoder_forward.6
= control target key start
LH: loop header
LB: loop body
LE: loop exit
PB: predicated region body
PF: predicated region fallthrough
CT: control target
= control target key end

     0   :  { %s1307_s13 = smov 0   ;;  %s1309_s14 = smov 0   ;;  %s1449_s0 = inlined_call_operand.vmem [shape: f32[2,8,32], index: 0, kind: input, shape index: {}]   ;;  %s1450_s1 = inlined_call_operand.vmem [shape: bf16[4,32,8], index: 1, kind: input, shape index: {}]   ;;  %s1451_s2 = inlined_call_operand.vmem [shape: bf16[4,32,8], index: 2, kind: input, shape index: {}]   ;;  %s1452_s3 = inlined_call_operand.vmem [shape: bf16[4,32,8], index: 3, kind: input, shape index: {}]   ;;  %s1453_s4 = inlined_call_operand.vmem [shape: f32[4,1,8], index: 4, kind: input, shape index: {}]   ;;  %s1454_s5 = inlined_call_operand.vmem [shape: f32[4,1,8], index: 5, kind: input, shape index: {}]   ;;  %s1455_s6 = inlined_call_operand.vmem [shape: f32[4,1,8], index: 6, kind: input, shape index: {}]   ;;  %s1456_s7 = inlined_call_operand.vmem [shape: bf16[4,8,32], index: 7, kind: input, shape index: {}]   ;;  %s1457_s8 = inlined_call_operand.vmem [shape: f32[1,32], index: 8, kind: input, shape index: {}]   ;;  %s1458_s9 = inlined_call_operand.vmem [shape: f32[2,1,8], index: 9, kind: input, shape index: {}]   ;;  %s1459_s10 = inlined_call_operand.vmem [shape: f32[2,8,32], index: 10, kind: output, shape index: {}]  }
   0x1   :  { %1463 = sst [smem:[#allocation8_spill]] %s1449_s0  ;;  %s1311_s15 = smov 0  }
   0x2   :  { %1464 = sst [smem:[#allocation9_spill]] %s1450_s1  ;;  %s1313_s16 = smov 0  }
   0x3   :  { %1465 = sst [smem:[#allocation10_spill]] %s1451_s2  ;;  %s1315_s17 = smov 0  }
   0x4   :  { %1466 = sst [smem:[#allocation11_spill]] %s1457_s8 }
   0x5 LB: > { %1467 = sst [smem:[#allocation3_spill]] %s1239_s15  ;;  %s32_s18 = sadd.s32 1, %s1239_s15  ;;  %s1247_s17 = sphi %s1315_s17, %s20_s17   ;;  %s1243_s16 = sphi %s1313_s16, %s1481_s16   ;;  %s1239_s15 = sphi %s1311_s15, %s1480_s15   ;;  %s1235_s14 = sphi %s1309_s14, %s1479_s14   ;;  %s1231_s13 = sphi %s1307_s13, %s1478_s13  }
   0x6   : > { %1468 = sst [smem:[#allocation4_spill]] %s1243_s16  ;;  %s39_s19 = sadd.s32 1, %s1243_s16 }
   0x7   : > { %1469 = sst [smem:[#allocation5_spill]] %s1247_s17  ;;  %p33_p0 = scmp.ge.s32.totalorder %s32_s18, 4 }
   0x8   : > { %p1065_p1 = scmp.ge.s32.totalorder %s1247_s17, 1  ;;  %p403_p2 = scmp.lt.s32.totalorder %s1247_s17, 9 }
   0x9   : > { %s1483_s18 = smov (%p33_p0, %s32_s18), 0  ;;  %s1485_s19 = smov (!%p33_p0, %s39_s19), %s1243_s16 }
   0xa   : > { %1470 = sst [smem:[#allocation6_spill]] %s1483_s18  ;;  %p404_p3 = pnand %p1065_p1, %p403_p2 }
   0xb   : > { %p41_p4 = scmp.ge.s32.totalorder %s1485_s19, 2  ;;  %p473_p5 = scmp.lt.s32.totalorder (!%p404_p3), %s1235_s14, 1 }
   0xc   : > { %407 = sbr.rel (%p404_p3) target bundleno = 1158 (0x486), region = 60  ;;  %p477_p6 = scmp.lt.s32.totalorder (!%p404_p3), %s1231_s13, 3 }
   0xd   : > { %s1487_s19 = smov (%p41_p4, %s1485_s19), 0  ;;  %s1472_s0 = sld [smem:[#allocation8_spill]] (!%p404_p3) }
   0xe   : > { %1471 = sst [smem:[#allocation7_spill]] %s1487_s19  ;;  %p1075_p7 = scmp.ne.s32.totalorder (!%p404_p3), %s1231_s13, 0 }
   0xf   : > { %s1473_s1 = sld [smem:[#allocation9_spill]] (!%p404_p3) }
  0x10   : > { %s1474_s2 = sld [smem:[#allocation10_spill]] (!%p404_p3) }
  0x11   : > { %s1489_s14 = smov (!%p473_p5, %s1235_s14), 1 }
  0x12   : > { %s1343_s20 = scalar_select %p477_p6, %s1231_s13, 3 }
  0x13   : > { %s1066_s21 = sshll.u32 %s1489_s14, 3 }
  0x14   : > { %s476_s27 = scalar_lea.vmem %s1472_s0, %s1066_s21  ;;  %s1096_s28 = sshll.u32 %s1343_s20, 4 }
  0x15   : > { %s481_s11 = scalar_lea.vmem %s1473_s1, %s1096_s28  ;;  %s1363_s17 = scalar_lea.vmem %s1452_s3, %s1096_s28 }
  0x16   : > { %s486_s18 = scalar_lea.vmem %s1474_s2, %s1096_s28  ;;  %s494_s24 = scalar_lea.vmem %s1453_s4, %s1343_s20 }
  0x17   : > { %s497_s0 = scalar_lea.vmem %s1454_s5, %s1343_s20  ;;  %s500_s30 = scalar_lea.vmem %s1455_s6, %s1343_s20 }
  0x18   : > { %s1073_s1 = sshll.u32 %s1343_s20, 2  ;;  %s1381_s2 = scalar_lea.vmem %s1459_s10, %s1066_s21 }
  0x19   : > { %s1386_s28 = scalar_lea.vmem %s1456_s7, %s1073_s1  ;;  %519 = sbr.rel (%p1075_p7) target bundleno = 32 (0x20), region = 64 }
  0x1e   : > { %vm520_vm0 = vcmask 261120   ;;  %v1249_v0 = vmov 0.0  }
  0x1f   : > { %521 = vst.msk [vmem:[#allocation2] sm:$0xff] %vm520_vm0, %v1249_v0 }
  0x20 PF: > { %v1199_v1 = vld [vmem:[%s486_s18 + $0x8] sm:$0xff]   ;;  %v1250_v2 = vmov 0.0   ;;  %v1201_v4 = vld [vmem:[%s486_s18] sm:$0xff]   ;;  %vm1251_vm1 = vmmov 0   ;;  %vm547_vm2 = vcmask 261120   ;;  %vm719_vm3 = vcmask 64512  }
  0x21   : > { %1122 = vmatprep.subr.bf16.mxu1 %v1250_v2  ;;  %1114 = vmatprep.subr.bf16.mxu0 %v1250_v2  ;;  %v1200_v3 = vld [vmem:[%s481_s11 + $0x8] sm:$0xff]   ;;  %v1202_v5 = vld [vmem:[%s481_s11] sm:$0xff]   ;;  %vm791_vm4 = vcmask 1043456   ;;  %p1092_p8 = scmp.ne.s32.totalorder %s1231_s13, 3 }
  0x22   : > { %1123 = vmatpush3.bf16.msra.mxu1 %v1199_v1  ;;  %1126 = vmatprep.mubr.msk.bf16.mxu1 %vm1251_vm1, %v1250_v2  ;;  %v522_v6 = vld [vmem:[%s476_s27] sm:$0xff]  ;;  %v1203_v23 = vld [vmem:[%s1363_s17 + $0x8] sm:$0xff]   ;;  %s1475_s27 = scalar_lea.vmem %s1458_s9, %s1489_s14  ;;  %s1476_s22 = sld [smem:[#allocation11_spill]] (!%p1092_p8) }
  0x23   : > { %1115 = vmatpush3.bf16.msra.mxu0 %v1200_v3  ;;  %1124 = vmatprep.subr.bf16.mxu1 %v1250_v2  ;;  %v523_v7 = vpack.c.bf16 %v522_v6, %v522_v6  ;;  %v1080_v8 = vld [vmem:[%s497_s0] ss:$0 sm:$0xff] }
  0x24   : > { %1116 = vmatprep.subr.bf16.mxu0 %v1250_v2  ;;  %1118 = vmatprep.mubr.msk.bf16.mxu0 %vm1251_vm1, %v1250_v2  ;;  %v1076_v13 = vld [vmem:[%s494_s24] ss:$0 sm:$0xff] }
  0x25   : > { %v1204_v24 = vld [vmem:[%s1363_s17] sm:$0xff]  }
  0x26   : > { %1125 = vmatpush3.bf16.msra.mxu1 %v1201_v4  ;;  %v1089_v26 = vld [vmem:[%s1475_s27] ss:$0 sm:$0xff] }
  0x27   : > { %1117 = vmatpush3.bf16.msra.mxu0 %v1202_v5  ;;  %1138 = vmatprep.subr.bf16.mxu1 %v1250_v2  ;;  %v1084_v38 = vld [vmem:[%s500_s30] ss:$0 sm:$0xff] }
  0x28   : > { %1130 = vmatprep.subr.bf16.mxu0 %v1250_v2  ;;  %v837_v46 = vld [vmem:[%s1386_s28] sm:$0xf] }
  0x29   : > { %1127 = vmatmul.mubr.msk.bf16.vlgmr.msra.gmra.mxu1 %vm547_vm2, %v523_v7  ;;  %v842_v47 = vsel %vm791_vm4, %v837_v46, 0  ;;  %v835_v57 = vld [vmem:[#allocation2] sm:$0xff] }
  0x2a   : > { %1119 = vmatmul.mubr.msk.bf16.vlgmr.msra.gmra.mxu0 %vm547_vm2, %v523_v7  ;;  %1140 = vmatprep.mubr.msk.bf16.mxu1 %vm1251_vm1, %v1250_v2 }
  0x2b   : > { %1134 = vmatprep.mubr.msk.bf16.mxu0 %vm1251_vm1, %v1250_v2  ;;  %1131 = vmatpush3.bf16.msra.mxu0 %v1203_v23 }
  0x2c   : > { %1132 = vmatprep.subr.bf16.mxu0 %v1250_v2 }
  0x2f   : > { %1133 = vmatpush3.bf16.msra.mxu0 %v1204_v24 }
  0x30   : > { %1144 = vmatprep.subr.bf16.mxu0 %v1250_v2 }
  0x32   : > { %1135 = vmatmul.mubr.msk.bf16.vlgmr.msra.gmra.mxu0 %vm547_vm2, %v523_v7 }
  0x33   : > { %1146 = vmatprep.mubr.msk.bf16.mxu0 %vm1251_vm1, %v1250_v2 }
  0xe9   : > { %v648_v9 = vpop.f32.mrf.mxu1 }
  0xea   : > { %v649_v10 = vadd.f32 %v1080_v8, %v648_v9  ;;  %v585_v11 = vpop.f32.mrf.mxu0 }
  0xeb   : > { %v1128_v12 = vpop.f32.mrf.mxu1  ;;  %v586_v18 = vadd.f32 %v1076_v13, %v585_v11 }
  0xec   : > { %v718_v14 = vpack.c.bf16 %v649_v10, %v649_v10  ;;  %v1120_v15 = vpop.f32.mrf.mxu0 }
  0xed   : > { %v651_v16 = vpop.f32.mrf.mxu1  ;;  %v717_v22 = vpack.c.bf16 %v586_v18, %v586_v18 }
  0xee   : > { %v724_v17 = vsel %vm719_vm3, %v718_v14, 0  ;;  %v588_v19 = vpop.f32.mrf.mxu0 }
  0xef   : > { %v1129_v20 = vpop.f32.mrf.mxu1  ;;  %1139 = vmatpush3.bf16.xpose.msra.mxu1 %v724_v17 }
  0xf0   : > { %v1121_v21 = vpop.f32.mrf.mxu0  ;;  %1150 = vmatprep.subr.bf16.mxu1 %v1250_v2 }
  0xf2   : > { %v711_v39 = vpop.f32.mrf.mxu0 }
  0xf3   : > { %v712_v40 = vadd.f32 %v1084_v38, %v711_v39 }
  0xf4   : > { %v1136_v41 = vpop.f32.mrf.mxu0 }
  0xf5   : > { %v787_v42 = vpack.c.bf16 %v712_v40, %v712_v40 }
  0xf6   : > { %1141 = vmatmul.mubr.msk.bf16.vlgmr.msra.gmra.mxu1 %vm719_vm3, %v717_v22  ;;  %v714_v43 = vpop.f32.mrf.mxu0 }
  0xf7   : > { %1152 = vmatprep.mubr.msk.bf16.mxu1 %vm1251_vm1, %v1250_v2  ;;  %v793_v44 = vsel %vm791_vm4, %v787_v42, 0  ;;  %1151 = vmatpush3.bf16.msra.mxu1 %v842_v47 }
  0xf8   : > { %v1137_v45 = vpop.f32.mrf.mxu0  ;;  %1145 = vmatpush3.bf16.msra.mxu0 %v793_v44 }
 0x1b6   : > { %v760_v25 = vpop.f32.mrf.mxu1 }
 0x1b7   : > { %v766_v27 = vmul.f32 0.35355338, %v760_v25 }
 0x1b8   : > { %v1142_v28 = vpop.f32.mrf.mxu1 }
 0x1b9   : > { %v774_v29 = vadd.f32 %v1089_v26, %v766_v27 }
 0x1ba   : > { %v763_v30 = vpop.f32.mrf.mxu1 }
 0x1bb   : > { %v775_v31 = vsel %vm719_vm3, %v774_v29, -inf }
 0x1bc   : > { %776 = vmax.xlane.f32.xlu0 %v775_v31  ;;  %v1143_v32 = vpop.f32.mrf.mxu1 }
 0x245   : > { %v777_v33 = vpop.xlane.xlu0 %776 }
 0x246   : > { %v778_v34 = vsub.f32 %v774_v29, %v777_v33 }
 0x248   : > { %v779_v35 = vmul.f32 1.442695, %v778_v34 }
 0x24a   : > { %1205 = vpow2.f32 %v779_v35 }
 0x257   : > { %v1206_v36 = vpop.eup %1205 }
 0x258   : > { %v781_v37 = vsel %vm719_vm3, %v1206_v36, 0.0 }
 0x259   : > { %782 = vadd.xlane.f32.xlu0 %v781_v37 }
 0x2e2   : > { %v783_v48 = vpop.xlane.xlu0 %782 }
 0x2e3   : > { %1207 = vrcp.f32 %v783_v48 }
 0x2f0   : > { %v1208_v49 = vpop.eup %1207 }
 0x2f1   : > { %v785_v50 = vmul.f32 %v1208_v49, %v1206_v36 }
 0x2f3   : > { %v786_v51 = vpack.c.bf16 %v785_v50, %v785_v50 }
 0x2f5   : > { %1147 = vmatmul.mubr.msk.bf16.vlgmr.msra.gmra.mxu0 %vm719_vm3, %v786_v51 }
 0x3b5   : > { %v829_v52 = vpop.f32.mrf.mxu0 }
 0x3b6   : > { %v836_v53 = vpack.c.bf16 %v829_v52, %v829_v52 }
 0x3b7   : > { %v1148_v54 = vpop.f32.mrf.mxu0 }
 0x3b8   : > { %1153 = vmatmul.mubr.msk.bf16.vlgmr.msra.gmra.mxu1 %vm719_vm3, %v836_v53 }
 0x3b9   : > { %v832_v55 = vpop.f32.mrf.mxu0 }
 0x3bb   : > { %v1149_v56 = vpop.f32.mrf.mxu0 }
 0x478   : > { %v878_v58 = vpop.f32.mrf.mxu1 }
 0x479   : > { %v884_v59 = vadd.f32 %v878_v58, %v835_v57 }
 0x47a   : > { %v1154_v60 = vpop.f32.mrf.mxu1  ;;  %889 = sbr.rel (%p1092_p8) target bundleno = 1158 (0x486), region = 68 }
 0x47b   : > { %885 = vst.msk [vmem:[#allocation2] sm:$0xff] %vm547_vm2, %v884_v59 }
 0x47c   : > { %v881_v61 = vpop.f32.mrf.mxu1 }
 0x47e   : > { %v1155_v62 = vpop.f32.mrf.mxu1 }
 0x47f   : > { %v1093_v0 = vld [vmem:[%s1476_s22] ss:$0 sm:$0xff] }
 0x482   : > { %v890_v63 = vld [vmem:[#allocation2] sm:$0xff] }
 0x483   : > { %v898_v1 = vadd.f32 %v1093_v0, %v890_v63 }
 0x485   : > { %899 = vst.msk [vmem:[%s1381_s2] sm:$0xff] %vm547_vm2, %v898_v1 }
 0x486 PF: > { %s1477_s23 = sld [smem:[#allocation5_spill]] }
 0x487   : > { %s1478_s13 = sld [smem:[#allocation3_spill]] }
 0x488   : > { %s1479_s14 = sld [smem:[#allocation4_spill]] }
 0x489   : > { %s1480_s15 = sld [smem:[#allocation6_spill]] }
 0x48a   : > { %s1481_s16 = sld [smem:[#allocation7_spill]] }
 0x48c   : > { %s20_s17 = sadd.s32 1, %s1477_s23  }
 0x48d   : > { %p17_p9 = scmp.ge.s32.totalorder %s20_s17, 10  }
 0x48f   :  { %19 = sbr.rel (!%p17_p9) target bundleno = 5 (0x5), region = 122 }

// kernel: transformer_encoder_forward.7
= control target key start
LH: loop header
LB: loop body
LE: loop exit
PB: predicated region body
PF: predicated region fallthrough
CT: control target
= control target key end

     0   :  { %vm48_vm0 = vcmask 261120   ;;  %v440_v18 = vmov 0.0   ;;  %vm441_vm1 = vmmov 0   ;;  %vm256_vm4 = vcmask 523264   ;;  %s576_s0 = inlined_call_operand.vmem [shape: f32[16,32], index: 0, kind: input, shape index: {}]   ;;  %s577_s1 = inlined_call_operand.vmem [shape: f32[16,32], index: 1, kind: input, shape index: {}]   ;;  %s578_s4 = inlined_call_operand.vmem [shape: bf16[32,64], index: 4, kind: input, shape index: {}]   ;;  %s579_s2 = inlined_call_operand.vmem [shape: f32[1,32], index: 2, kind: input, shape index: {}]   ;;  %s580_s3 = inlined_call_operand.vmem [shape: f32[1,32], index: 3, kind: input, shape index: {}]   ;;  %s581_s6 = inlined_call_operand.vmem [shape: bf16[64,32], index: 6, kind: input, shape index: {}]   ;;  %s582_s5 = inlined_call_operand.vmem [shape: f32[1,64], index: 5, kind: input, shape index: {}]   ;;  %s583_s7 = inlined_call_operand.vmem [shape: f32[1,32], index: 7, kind: input, shape index: {}]   ;;  %s584_s8 = inlined_call_operand.vmem [shape: f32[1,32], index: 8, kind: input, shape index: {}]   ;;  %s585_s9 = inlined_call_operand.vmem [shape: f32[1,32], index: 9, kind: input, shape index: {}]   ;;  %s586_s10 = inlined_call_operand.vmem [shape: f32[16,32], index: 10, kind: output, shape index: {}]  }
   0x1   :  { %v40_v0 = vld [vmem:[%s577_s1] sm:$0xff]  ;;  %v41_v2 = vld [vmem:[%s577_s1 + $0x8] sm:$0xff]  ;;  %396 = vmatprep.subr.bf16.mxu0 %v440_v18  ;;  %94 = vst.msk [vmem:[#allocation3] sm:$0xff] %vm48_vm0, %v440_v18  ;;  %95 = vst.msk [vmem:[#allocation3 + $0x8] sm:$0xff] %vm48_vm0, %v440_v18  ;;  %400 = vmatprep.mubr.msk.bf16.mxu0 %vm441_vm1, %v440_v18 }
   0x2   :  { %v42_v1 = vld [vmem:[%s576_s0] sm:$0xff]  ;;  %v43_v4 = vld [vmem:[%s576_s0 + $0x8] sm:$0xff]  ;;  %404 = vmatprep.subr.bf16.mxu1 %v440_v18  ;;  %412 = vmatprep.mubr.msk.bf16.mxu1 %vm441_vm1, %v440_v18  ;;  %v420_v40 = vld [vmem:[%s581_s6 + $0x18] sm:$0xff]  }
   0x3   :  { %v44_v3 = vadd.f32 %v42_v1, %v40_v0  ;;  %v45_v5 = vadd.f32 %v43_v4, %v41_v2  ;;  %v418_v19 = vld [vmem:[%s578_s4 + $0x8] sm:$0xff]   ;;  %v419_v20 = vld [vmem:[%s578_s4] sm:$0xff]   ;;  %405 = vmatpush3.bf16.msra.mxu1 %v420_v40  ;;  %v421_v41 = vld [vmem:[%s581_s6 + $0x10] sm:$0xff]  }
   0x4   :  { %397 = vmatpush3.bf16.msra.mxu0 %v418_v19  ;;  %v374_v28 = vld [vmem:[%s579_s2] ss:$0 sm:$0xff]  ;;  %406 = vmatprep.subr.bf16.mxu1 %v440_v18  ;;  %v422_v42 = vld [vmem:[%s581_s6 + $0x8] sm:$0xff]  }
   0x5   :  { %v49_v6 = vsel %vm48_vm0, %v44_v3, 0.0  ;;  %v52_v7 = vsel %vm48_vm0, %v45_v5, 0.0  ;;  %398 = vmatprep.subr.bf16.mxu0 %v440_v18  ;;  %v375_v30 = vld [vmem:[%s580_s3] ss:$0 sm:$0xff] }
   0x6   :  { %50 = vadd.xlane.f32.xlu0 %v49_v6  ;;  %v423_v43 = vld [vmem:[%s581_s6] sm:$0xff]  }
   0x7   :  { %407 = vmatpush3.bf16.msra.mxu1 %v421_v41  ;;  %v376_v44 = vld [vmem:[%s582_s5] ss:$0 sm:$0xff] }
   0x8   :  { %399 = vmatpush3.bf16.msra.mxu0 %v419_v20  ;;  %408 = vmatprep.subr.bf16.mxu1 %v440_v18  ;;  %v221_v40 = vld [vmem:[#allocation3] sm:$0xff] }
   0xa   :  { %53 = vadd.xlane.f32.xlu0 %v52_v7 }
   0xb   :  { %409 = vmatpush3.bf16.msra.mxu1 %v422_v42 }
   0xc   :  { %410 = vmatprep.subr.bf16.mxu1 %v440_v18 }
   0xf   :  { %411 = vmatpush3.bf16.msra.mxu1 %v423_v43 }
  0x8f   :  { %v51_v8 = vpop.xlane.xlu0 %50 }
  0x90   :  { %v56_v9 = vmul.f32 0.03125, %v51_v8 }
  0x92   :  { %v58_v10 = vsub.f32 %v44_v3, %v56_v9 }
  0x93   :  { %v54_v11 = vpop.xlane.xlu0 %53 }
  0x94   :  { %v57_v12 = vmul.f32 0.03125, %v54_v11  ;;  %v60_v13 = vmul.f32 %v58_v10, %v58_v10 }
  0x96   :  { %v59_v14 = vsub.f32 %v45_v5, %v57_v12  ;;  %v62_v15 = vsel %vm48_vm0, %v60_v13, 0.0 }
  0x97   :  { %63 = vadd.xlane.f32.xlu1 %v62_v15 }
  0x98   :  { %v61_v16 = vmul.f32 %v59_v14, %v59_v14 }
  0x9a   :  { %v65_v17 = vsel %vm48_vm0, %v61_v16, 0.0 }
  0x9b   :  { %66 = vadd.xlane.f32.xlu1 %v65_v17 }
 0x120   :  { %v64_v21 = vpop.xlane.xlu1 %63 }
 0x121   :  { %v68_v22 = vmul.f32 0.03125, %v64_v21 }
 0x123   :  { %v70_v23 = vadd.f32 1e-05, %v68_v22 }
 0x124   :  { %v67_v24 = vpop.xlane.xlu1 %66 }
 0x125   :  { %424 = vrsqrt.f32 %v70_v23  ;;  %v69_v25 = vmul.f32 0.03125, %v67_v24 }
 0x127   :  { %v71_v26 = vadd.f32 1e-05, %v69_v25 }
 0x129   :  { %426 = vrsqrt.f32 %v71_v26 }
 0x132   :  { %v425_v27 = vpop.eup %424 }
 0x133   :  { %v74_v29 = vmul.f32 %v425_v27, %v58_v10 }
 0x135   :  { %v82_v31 = vmul.f32 %v374_v28, %v74_v29 }
 0x136   :  { %v427_v32 = vpop.eup %426 }
 0x137   :  { %v90_v33 = vadd.f32 %v375_v30, %v82_v31  ;;  %v75_v34 = vmul.f32 %v427_v32, %v59_v14 }
 0x139   :  { %92 = vst.msk [vmem:[#allocation2] sm:$0xff] %vm48_vm0, %v90_v33  ;;  %v83_v35 = vmul.f32 %v374_v28, %v75_v34 }
 0x13b   :  { %v91_v36 = vadd.f32 %v375_v30, %v83_v35 }
 0x13d   :  { %93 = vst.msk [vmem:[#allocation2 + $0x8] sm:$0xff] %vm48_vm0, %v91_v36 }
 0x140   :  { %v529_v37 = vld [vmem:[#allocation2] sm:$0xff] }
 0x144   :  { %v531_v38 = vld [vmem:[#allocation2 + $0x8] sm:$0xff] }
 0x145   :  { %v98_v39 = vpack.c.bf16 %v531_v38, %v529_v37 }
 0x147   :  { %401 = vmatmul.mubr.msk.bf16.vlgmr.msra.gmra.mxu0 %vm48_vm0, %v98_v39 }
 0x207   :  { %v160_v45 = vpop.f32.mrf.mxu0 }
 0x208   :  { %v161_v46 = vadd.f32 %v376_v44, %v160_v45 }
 0x209   :  { %v402_v47 = vpop.f32.mrf.mxu0 }
 0x20a   :  { %v169_v48 = vmul.f32 0.70710677, %v161_v46  ;;  %v167_v32 = vmul.f32 0.5, %v161_v46 }
 0x20b   :  { %v163_v49 = vpop.f32.mrf.mxu0 }
 0x20c   :  { %v171_v50 = vand.u32 2147483647, %v169_v48  ;;  %v164_v51 = vadd.f32 %v376_v44, %v163_v49  ;;  %vm211_vm2 = vcmp.lt.f32.partialorder %v169_v48, 0.0  ;;  %v222_v44 = vld [vmem:[#allocation3 + $0x8] sm:$0xff]  ;;  %v385_v49 = vld [vmem:[%s583_s7] ss:$0 sm:$0xff] }
 0x20d   :  { %v403_v52 = vpop.f32.mrf.mxu0 }
 0x20e   :  { %v173_v53 = vmul.f32 0.3275911, %v171_v50  ;;  %v170_v54 = vmul.f32 0.70710677, %v164_v51  ;;  %v199_v59 = vsub.f32 0.0, %v171_v50  ;;  %v168_v33 = vmul.f32 0.5, %v164_v51 }
 0x210   :  { %v175_v55 = vadd.f32 1.0, %v173_v53  ;;  %v172_v56 = vand.u32 2147483647, %v170_v54  ;;  %v201_v60 = vmul.f32 %v199_v59, %v171_v50  ;;  %vm212_vm3 = vcmp.lt.f32.partialorder %v170_v54, 0.0 }
 0x212   :  { %428 = vrcp.f32 %v175_v55  ;;  %v174_v57 = vmul.f32 0.3275911, %v172_v56  ;;  %v200_v61 = vsub.f32 0.0, %v172_v56  ;;  %v203_v0 = vmul.f32 1.442695, %v201_v60 }
 0x214   :  { %v176_v58 = vadd.f32 1.0, %v174_v57  ;;  %v202_v1 = vmul.f32 %v200_v61, %v172_v56 }
 0x216   :  { %430 = vrcp.f32 %v176_v58  ;;  %v205_v6 = vmul.f32 1.442695, %v202_v1 }
 0x217   :  { %432 = vpow2.f32 %v203_v0 }
 0x218   :  { %434 = vpow2.f32 %v205_v6 }
 0x21f   :  { %v429_v62 = vpop.eup %428 }
 0x220   :  { %v181_v63 = vmul.f32 1.0614054, %v429_v62 }
 0x222   :  { %v183_v2 = vadd.f32 -1.4531521, %v181_v63 }
 0x223   :  { %v431_v3 = vpop.eup %430 }
 0x224   :  { %v185_v4 = vmul.f32 %v429_v62, %v183_v2  ;;  %v182_v5 = vmul.f32 1.0614054, %v431_v3  ;;  %v433_v19 = vpop.eup %432 }
 0x225   :  { %v435_v24 = vpop.eup %434 }
 0x226   :  { %v187_v7 = vadd.f32 1.4214138, %v185_v4  ;;  %v184_v8 = vadd.f32 -1.4531521, %v182_v5 }
 0x228   :  { %v189_v9 = vmul.f32 %v429_v62, %v187_v7  ;;  %v186_v10 = vmul.f32 %v431_v3, %v184_v8  ;;  %v386_v8 = vld [vmem:[%s584_s8] ss:$0 sm:$0xff] }
 0x22a   :  { %v191_v11 = vadd.f32 -0.28449672, %v189_v9  ;;  %v188_v12 = vadd.f32 1.4214138, %v186_v10  ;;  %v387_v10 = vld [vmem:[%s585_s9] ss:$0 sm:$0xff] }
 0x22c   :  { %v193_v13 = vmul.f32 %v429_v62, %v191_v11  ;;  %v190_v14 = vmul.f32 %v431_v3, %v188_v12 }
 0x22e   :  { %v195_v15 = vadd.f32 0.2548296, %v193_v13  ;;  %v192_v16 = vadd.f32 -0.28449672, %v190_v14 }
 0x230   :  { %v197_v17 = vmul.f32 %v429_v62, %v195_v15  ;;  %v194_v18 = vmul.f32 %v431_v3, %v192_v16 }
 0x232   :  { %v207_v20 = vmul.f32 %v433_v19, %v197_v17  ;;  %v196_v21 = vadd.f32 0.2548296, %v194_v18 }
 0x234   :  { %v209_v22 = vsub.f32 1.0, %v207_v20  ;;  %v198_v23 = vmul.f32 %v431_v3, %v196_v21 }
 0x236   :  { %v213_v25 = vsub.f32 0.0, %v209_v22  ;;  %v208_v26 = vmul.f32 %v435_v24, %v198_v23 }
 0x238   :  { %v215_v27 = vsel %vm211_vm2, %v213_v25, %v209_v22  ;;  %v210_v28 = vsub.f32 1.0, %v208_v26 }
 0x239   :  { %v217_v30 = vadd.f32 1.0, %v215_v27 }
 0x23a   :  { %v214_v29 = vsub.f32 0.0, %v210_v28 }
 0x23b   :  { %v219_v35 = vmul.f32 %v217_v30, %v167_v32 }
 0x23c   :  { %v216_v31 = vsel %vm212_vm3, %v214_v29, %v210_v28 }
 0x23d   :  { %v218_v34 = vadd.f32 1.0, %v216_v31 }
 0x23f   :  { %v220_v36 = vmul.f32 %v218_v34, %v168_v33 }
 0x241   :  { %v223_v39 = vpack.c.bf16 %v220_v36, %v219_v35 }
 0x243   :  { %413 = vmatmul.mubr.msk.bf16.vlgmr.msra.gmra.mxu1 %vm256_vm4, %v223_v39 }
 0x303   :  { %v294_v41 = vpop.f32.mrf.mxu1 }
 0x304   :  { %v301_v42 = vadd.f32 %v294_v41, %v221_v40 }
 0x305   :  { %v414_v43 = vpop.f32.mrf.mxu1 }
 0x306   :  { %303 = vst.msk [vmem:[#allocation3] sm:$0xff] %vm48_vm0, %v301_v42 }
 0x307   :  { %v297_v45 = vpop.f32.mrf.mxu1 }
 0x308   :  { %v302_v47 = vadd.f32 %v297_v45, %v222_v44 }
 0x309   :  { %v415_v48 = vpop.f32.mrf.mxu1 }
 0x30a   :  { %304 = vst.msk [vmem:[#allocation3 + $0x8] sm:$0xff] %vm48_vm0, %v302_v47 }
 0x30d   :  { %v310_v46 = vld [vmem:[#allocation3] sm:$0xff] }
 0x30e   :  { %v312_v50 = vadd.f32 %v310_v46, %v529_v37 }
 0x310   :  { %v321_v51 = vadd.f32 %v385_v49, %v312_v50 }
 0x311   :  { %v311_v52 = vld [vmem:[#allocation3 + $0x8] sm:$0xff] }
 0x312   :  { %v325_v53 = vsel %vm48_vm0, %v321_v51, 0.0  ;;  %v313_v54 = vadd.f32 %v311_v52, %v531_v38 }
 0x313   :  { %326 = vadd.xlane.f32.xlu0 %v325_v53 }
 0x314   :  { %v322_v55 = vadd.f32 %v385_v49, %v313_v54 }
 0x316   :  { %v328_v56 = vsel %vm48_vm0, %v322_v55, 0.0 }
 0x317   :  { %329 = vadd.xlane.f32.xlu1 %v328_v56 }
 0x39c   :  { %v327_v57 = vpop.xlane.xlu0 %326 }
 0x39d   :  { %v332_v58 = vmul.f32 0.03125, %v327_v57 }
 0x39f   :  { %v334_v59 = vsub.f32 %v321_v51, %v332_v58 }
 0x3a0   :  { %v330_v60 = vpop.xlane.xlu1 %329 }
 0x3a1   :  { %v333_v61 = vmul.f32 0.03125, %v330_v60  ;;  %v336_v62 = vmul.f32 %v334_v59, %v334_v59 }
 0x3a3   :  { %v335_v63 = vsub.f32 %v322_v55, %v333_v61  ;;  %v338_v37 = vsel %vm48_vm0, %v336_v62, 0.0 }
 0x3a4   :  { %339 = vadd.xlane.f32.xlu0 %v338_v37 }
 0x3a5   :  { %v337_v0 = vmul.f32 %v335_v63, %v335_v63 }
 0x3a7   :  { %v341_v1 = vsel %vm48_vm0, %v337_v0, 0.0 }
 0x3a8   :  { %342 = vadd.xlane.f32.xlu1 %v341_v1 }
 0x42d   :  { %v340_v38 = vpop.xlane.xlu0 %339 }
 0x42e   :  { %v344_v2 = vmul.f32 0.03125, %v340_v38 }
 0x430   :  { %v346_v3 = vadd.f32 1e-05, %v344_v2 }
 0x431   :  { %v343_v4 = vpop.xlane.xlu1 %342 }
 0x432   :  { %436 = vrsqrt.f32 %v346_v3  ;;  %v345_v5 = vmul.f32 0.03125, %v343_v4 }
 0x434   :  { %v347_v6 = vadd.f32 1e-05, %v345_v5 }
 0x436   :  { %438 = vrsqrt.f32 %v347_v6 }
 0x43f   :  { %v437_v7 = vpop.eup %436 }
 0x440   :  { %v350_v9 = vmul.f32 %v437_v7, %v334_v59 }
 0x442   :  { %v358_v11 = vmul.f32 %v386_v8, %v350_v9 }
 0x443   :  { %v439_v12 = vpop.eup %438 }
 0x444   :  { %v366_v13 = vadd.f32 %v387_v10, %v358_v11  ;;  %v351_v14 = vmul.f32 %v439_v12, %v335_v63 }
 0x446   :  { %368 = vst.msk [vmem:[%s586_s10] sm:$0xff] %vm48_vm0, %v366_v13  ;;  %v359_v15 = vmul.f32 %v386_v8, %v351_v14 }
 0x448   :  { %v367_v16 = vadd.f32 %v387_v10, %v359_v15 }
 0x44a   :  { %369 = vst.msk [vmem:[%s586_s10 + $0x8] sm:$0xff] %vm48_vm0, %v367_v16 }

</bundles_post_ra>
